<compile_context>
chip_gen: v7x
topology: tpu7x:2x2x1
jax: 0.10.0
libtpu: 0.0.40
codegen_flags: <defaults>
</compile_context>

<pallas_src>
import functools
import math

import jax
import jax.numpy as jnp
from jax import lax
from jax.experimental import pallas as pl
from jax.experimental.pallas import tpu as pltpu


def _gelu_tanh(x):
    # 0.5 * x * (1 + tanh(sqrt(2/pi) * (x + 0.044715 * x^3)))
    c = jnp.sqrt(jnp.asarray(2.0 / jnp.pi, x.dtype))
    return 0.5 * x * (1.0 + jnp.tanh(c * (x + 0.044715 * x * x * x)))


def _layernorm(x, scale, shift, eps=1e-5):
    # PyTorch LayerNorm semantics: mean / var(unbiased=False) over last dim.
    # Single pass E[x^2] - mean^2, clamped at 0 against f32 cancellation;
    # rsqrt goes to the EUP slot.
    mean = jnp.mean(x, axis=-1, keepdims=True)
    var = jnp.maximum(jnp.mean(x * x, axis=-1, keepdims=True) - mean * mean, 0.0)
    inv = lax.rsqrt(var + eps)
    return (x - mean) * inv * scale + shift


def transformer_block_kernel(x_ref, ln1_s_ref, ln1_b_ref,
                             wq_ref, wk_ref, wv_ref, wo_ref, bo_ref,
                             ln2_s_ref, ln2_b_ref,
                             w1_ref, b1_ref, w2_ref, b2_ref,
                             out_ref, *, num_heads, seq_len, ff_chunk,
                             matmul_dtype):
    f32 = jnp.float32
    md = matmul_dtype
    x = x_ref[...].astype(f32)                       # (rows, D) activation slab
    rows, D = x.shape
    T = seq_len
    Bb = rows // T                                   # whole sequences per block
    H = num_heads
    Dh = D // H
    dh_aligned = (Dh % 128 == 0)                     # static path selection

    # ---- LayerNorm 1 (the LayerNorm module under test) ----
    xn = _layernorm(x, ln1_s_ref[...], ln1_b_ref[...])
    xn_m = xn.astype(md)                             # hoisted cast, once per block

    # causal mask: computed once, reused across heads; finite mask value is
    # robust even if a row were ever fully masked (exp underflows to exactly 0)
    ri = lax.broadcasted_iota(jnp.int32, (T, T), 0)
    ci = lax.broadcasted_iota(jnp.int32, (T, T), 1)
    causal = (ci > ri)[None, :, :]                   # (1, T, T)
    inv_sqrt_dh = jnp.asarray(1.0 / math.sqrt(Dh), f32)

    # ---- causal multi-head attention ----
    # TODO(synk): switch to an online-softmax (flash) kv-block loop once T is
    # large enough that the (Bb, T, T) score tile stops fitting VMEM.
    attn = jnp.zeros((rows, D), f32)
    ctx_heads = []
    for h in range(H):                               # static loop over heads
        # per-head projections: leading-axis weight slices -> no lane shuffles,
        # contraction depth stays K=D on every MXU push.
        qh = jnp.dot(xn_m, wq_ref[h], preferred_element_type=f32)   # (rows, Dh)
        kh = jnp.dot(xn_m, wk_ref[h], preferred_element_type=f32)
        vh = jnp.dot(xn_m, wv_ref[h], preferred_element_type=f32)
        # leading-dim reshape only (lane dim untouched): (rows, Dh) -> (Bb, T, Dh)
        q3 = qh.reshape(Bb, T, Dh).astype(md)
        k3 = kh.reshape(Bb, T, Dh).astype(md)
        v3 = vh.reshape(Bb, T, Dh).astype(md)

        s = jnp.einsum("bqd,bkd->bqk", q3, k3,
                       preferred_element_type=f32) * inv_sqrt_dh     # (Bb, T, T)
        s = jnp.where(causal, f32(-1e30), s)
        s = s - jnp.max(s, axis=-1, keepdims=True)
        p = jnp.exp(s)
        denom = jnp.sum(p, axis=-1, keepdims=True)
        r = pl.reciprocal(denom, approx=True)        # EUP slot (free vs VALU)
        r = r * (2.0 - denom * r)                    # one Newton step -> ~f32 exact
        p = p * r

        ctx = jnp.einsum("bqk,bkd->bqd", p.astype(md), v3,
                         preferred_element_type=f32)                  # (Bb, T, Dh)
        ctx2 = ctx.reshape(rows, Dh)
        if dh_aligned:
            ctx_heads.append(ctx2.astype(md))        # lane-aligned concat below
        else:
            # lane-misaligned head dim: fold head h straight into Wo[h]
            attn = attn + jnp.dot(ctx2.astype(md), wo_ref[h],
                                  preferred_element_type=f32)
    if dh_aligned:
        # single K=D output projection (one deep MXU contraction instead of H
        # shallow K=Dh ones); concat offsets are multiples of 128 -> free.
        ctx_all = jnp.concatenate(ctx_heads, axis=-1)                 # (rows, D)
        attn = jnp.dot(ctx_all, wo_ref[...].reshape(D, D),
                       preferred_element_type=f32)

    y = attn + bo_ref[...].astype(f32) + x           # residual 1 (dropout = id)

    # ---- LayerNorm 2 + FeedForward (GELU), hidden dim in aligned chunks ----
    yn = _layernorm(y, ln2_s_ref[...], ln2_b_ref[...])
    yn_m = yn.astype(md)
    D4 = w1_ref.shape[1]
    b1 = b1_ref[...].astype(f32)                     # (1, D4), loaded once
    ff = jnp.zeros((rows, D), f32)
    for lo in range(0, D4, ff_chunk):                # static 128-aligned chunks
        h1 = jnp.dot(yn_m, w1_ref[:, lo:lo + ff_chunk],
                     preferred_element_type=f32) + b1[:, lo:lo + ff_chunk]
        h1 = _gelu_tanh(h1)
        ff = ff + jnp.dot(h1.astype(md), w2_ref[lo:lo + ff_chunk, :],
                          preferred_element_type=f32)

    out_ref[...] = (ff + b2_ref[...].astype(f32) + y).astype(out_ref.dtype)


def transformer_block(x, params, num_heads, *, matmul_dtype=jnp.float32):
    B, T, D = x.shape
    H = num_heads
    Dh = D // H
    D4 = params["w1"].shape[1]
    R = B * T
    md = matmul_dtype

    # Per-head weight stacks with head as the LEADING axis (avoids in-kernel
    # lane-offset slicing when Dh % 128 != 0; leading-axis indexing is free).
    def split_heads_in(w):                            # (D, D) -> (H, D, Dh)
        return jnp.transpose(w.reshape(D, H, Dh), (1, 0, 2)).astype(md)

    wq_h = split_heads_in(params["wq"])
    wk_h = split_heads_in(params["wk"])
    wv_h = split_heads_in(params["wv"])
    wo_h = params["wo"].reshape(H, Dh, D).astype(md)  # rows already grouped by head
    w1 = params["w1"].astype(md)
    w2 = params["w2"].astype(md)

    # FF hidden-dim chunk: bound the (rows, 4D) live temporary, 128-aligned.
    ff_chunk = 512 if (D4 >= 1024 and D4 % 512 == 0) else D4

    # Size-gated row-block grid over whole sequences (causal attention is
    # sequence-local).  Tiny problems: one grid step (per-step overhead ~0.35us
    # dominates).  Large problems: ~512-row blocks, marked "parallel" so v7x's
    # two TensorCores split on rows (works for B==1 as long as B*T has >1 seq).
    if R <= 512:
        seqs_per_block = B
    else:
        spb = min(B, max(1, 512 // T))
        while B % spb:                                # largest divisor of B <= spb
            spb -= 1
        seqs_per_block = spb
    num_blocks = B // seqs_per_block
    rows = seqs_per_block * T

    x2 = x.reshape(R, D)                              # dense activation slab

    act_spec = pl.BlockSpec((rows, D), lambda i: (i, 0))

    # Weights: constant index_map (fetched once, never re-DMA'd).  On the
    # multi-step path, single-buffer them so they are not double-buffered.
    if num_blocks > 1:
        def w_spec(shape):
            return pl.BlockSpec(shape, lambda i: (0,) * len(shape),
                                pipeline_mode=pl.Buffered(1))
    else:
        def w_spec(shape):
            return pl.BlockSpec(shape, lambda i: (0,) * len(shape))

    in_specs = [
        act_spec,                                     # x slab
        w_spec((1, D)), w_spec((1, D)),               # ln1 scale / shift
        w_spec((H, D, Dh)), w_spec((H, D, Dh)), w_spec((H, D, Dh)),   # Wq/Wk/Wv
        w_spec((H, Dh, D)), w_spec((1, D)),           # Wo, bo
        w_spec((1, D)), w_spec((1, D)),               # ln2 scale / shift
        w_spec((D, D4)), w_spec((1, D4)),             # W1, b1
        w_spec((D4, D)), w_spec((1, D)),              # W2, b2
    ]

    # VMEM budget estimate: weights (<=2 buffers) + live activation temporaries.
    itemsize = jnp.dtype(md).itemsize
    weight_bytes = itemsize * (3 * H * D * Dh + D * D + 2 * D * D4)
    act_bytes = 4 * rows * (10 * D + ff_chunk) + 12 * seqs_per_block * T * T
    est_bytes = 2 * weight_bytes + act_bytes
    compiler_kwargs = dict(dimension_semantics=("parallel",))
    if est_bytes > 12 * (1 << 20):
        # Raise scoped VMEM explicitly (capped at v7x's 64 MiB physical).
        # TODO(synk): when even single-buffered weights exceed ~48 MiB, stream
        # W1/W2 over a reduction grid axis instead of raising the limit.
        compiler_kwargs["vmem_limit_bytes"] = int(min(est_bytes + (8 << 20), 64 << 20))

    kernel = functools.partial(transformer_block_kernel,
                               num_heads=H, seq_len=T, ff_chunk=ff_chunk,
                               matmul_dtype=md)
    out2 = pl.pallas_call(
        kernel,
        out_shape=jax.ShapeDtypeStruct((R, D), jnp.float32),
        grid=(num_blocks,),
        in_specs=in_specs,
        out_specs=act_spec,
        compiler_params=pltpu.CompilerParams(**compiler_kwargs),
    )(x2, params["ln1_s"], params["ln1_b"],
      wq_h, wk_h, wv_h, wo_h, params["bo"],
      params["ln2_s"], params["ln2_b"],
      w1, params["b1"], w2, params["b2"])
    return out2.reshape(B, T, D)


# ----------------- pure-JAX reference (mirrors the PyTorch forward) -----------------
def reference(x, p, num_heads):
    def ln(z, s, b, eps=1e-5):
        m = jnp.mean(z, axis=-1, keepdims=True)
        v = jnp.mean((z - m) ** 2, axis=-1, keepdims=True)
        return (z - m) / jnp.sqrt(v + eps) * s[0] + b[0]

    B, T, D = x.shape
    Dh = D // num_heads
    xn = ln(x, p["ln1_s"], p["ln1_b"])
    q = xn @ p["wq"]
    k = xn @ p["wk"]
    v = xn @ p["wv"]
    q = q.reshape(B, T, num_heads, Dh).transpose(0, 2, 1, 3)
    k = k.reshape(B, T, num_heads, Dh).transpose(0, 2, 1, 3)
    v = v.reshape(B, T, num_heads, Dh).transpose(0, 2, 1, 3)
    s = jnp.einsum("bhqd,bhkd->bhqk", q, k) / math.sqrt(Dh)
    mask = jnp.triu(jnp.ones((T, T), bool), k=1)
    s = jnp.where(mask, -jnp.inf, s)
    w = jax.nn.softmax(s, axis=-1)
    ctx = jnp.einsum("bhqk,bhkd->bhqd", w, v).transpose(0, 2, 1, 3).reshape(B, T, D)
    attn = ctx @ p["wo"] + p["bo"][0]
    y = attn + x
    yn = ln(y, p["ln2_s"], p["ln2_b"])
    h1 = yn @ p["w1"] + p["b1"][0]
    h1 = 0.5 * h1 * (1 + jnp.tanh(jnp.sqrt(2.0 / jnp.pi) * (h1 + 0.044715 * h1 ** 3)))
    h2 = h1 @ p["w2"] + p["b2"][0]
    return h2 + y


if __name__ == "__main__":
    # config: embedding_dim=32, n_heads=4, context_length=8, dropout=0.0 (inference)
    B, T, D, H = 2, 8, 32, 4
    D4 = 4 * D

    key = jax.random.PRNGKey(0)
    ks = jax.random.split(key, 10)
    params = {
        "ln1_s": jnp.ones((1, D), jnp.float32),
        "ln1_b": jnp.zeros((1, D), jnp.float32),
        "wq": 0.05 * jax.random.normal(ks[0], (D, D), jnp.float32),
        "wk": 0.05 * jax.random.normal(ks[1], (D, D), jnp.float32),
        "wv": 0.05 * jax.random.normal(ks[2], (D, D), jnp.float32),
        "wo": 0.05 * jax.random.normal(ks[3], (D, D), jnp.float32),
        "bo": 0.05 * jax.random.normal(ks[4], (1, D), jnp.float32),
        "ln2_s": jnp.ones((1, D), jnp.float32),
        "ln2_b": jnp.zeros((1, D), jnp.float32),
        "w1": 0.05 * jax.random.normal(ks[5], (D, D4), jnp.float32),
        "b1": 0.05 * jax.random.normal(ks[6], (1, D4), jnp.float32),
        "w2": 0.05 * jax.random.normal(ks[7], (D4, D), jnp.float32),
        "b2": 0.05 * jax.random.normal(ks[8], (1, D), jnp.float32),
    }
    x = jax.random.normal(ks[9], (B, T, D), jnp.float32)

    # matmul_dtype defaults to f32 so the 1e-4 check holds; pass
    # matmul_dtype=jnp.bfloat16 for ~3x MXU throughput / half the weight DMA
    # at a looser tolerance.
    out = jax.jit(functools.partial(transformer_block, num_heads=H))(x, params)
    out = jax.block_until_ready(out)

    ref = reference(x, params, H)
    assert out.shape == (B, T, D)
    assert jnp.allclose(out, ref, atol=1e-4, rtol=1e-4), \
        f"max abs diff {jnp.max(jnp.abs(out - ref))}"
    print("KERNEL_OK")
</pallas_src>

<mosaic_0001>
module attributes {stable_mosaic.version = 11 : i64} {
  func.func @transformer_block_kernel(%arg0: i32, %arg1: memref<16x32xf32, #tpu.memory_space<vmem>>, %arg2: memref<1x32xf32, #tpu.memory_space<vmem>>, %arg3: memref<1x32xf32, #tpu.memory_space<vmem>>, %arg4: memref<4x32x8xf32, #tpu.memory_space<vmem>>, %arg5: memref<4x32x8xf32, #tpu.memory_space<vmem>>, %arg6: memref<4x32x8xf32, #tpu.memory_space<vmem>>, %arg7: memref<4x8x32xf32, #tpu.memory_space<vmem>>, %arg8: memref<1x32xf32, #tpu.memory_space<vmem>>, %arg9: memref<1x32xf32, #tpu.memory_space<vmem>>, %arg10: memref<1x32xf32, #tpu.memory_space<vmem>>, %arg11: memref<32x128xf32, #tpu.memory_space<vmem>>, %arg12: memref<1x128xf32, #tpu.memory_space<vmem>>, %arg13: memref<128x32xf32, #tpu.memory_space<vmem>>, %arg14: memref<1x32xf32, #tpu.memory_space<vmem>>, %arg15: memref<16x32xf32, #tpu.memory_space<vmem>>) attributes {dimension_semantics = [#tpu.dimension_semantics<parallel>], iteration_bounds = array<i64: 1>, scalar_prefetch = 0 : i64, scratch_operands = 0 : i64, tpu.core_type = #tpu.core_type<tc>, window_params = [{transform_indices = @transform_0, window_bounds = array<i64: 16, 32>}, {pipeline_mode = #tpu.pipeline_mode<synchronous>, transform_indices = @transform_1, window_bounds = array<i64: 1, 32>}, {pipeline_mode = #tpu.pipeline_mode<synchronous>, transform_indices = @transform_2, window_bounds = array<i64: 1, 32>}, {pipeline_mode = #tpu.pipeline_mode<synchronous>, transform_indices = @transform_3, window_bounds = array<i64: 4, 32, 8>}, {pipeline_mode = #tpu.pipeline_mode<synchronous>, transform_indices = @transform_4, window_bounds = array<i64: 4, 32, 8>}, {pipeline_mode = #tpu.pipeline_mode<synchronous>, transform_indices = @transform_5, window_bounds = array<i64: 4, 32, 8>}, {pipeline_mode = #tpu.pipeline_mode<synchronous>, transform_indices = @transform_6, window_bounds = array<i64: 4, 8, 32>}, {pipeline_mode = #tpu.pipeline_mode<synchronous>, transform_indices = @transform_7, window_bounds = array<i64: 1, 32>}, {pipeline_mode = #tpu.pipeline_mode<synchronous>, transform_indices = @transform_8, window_bounds = array<i64: 1, 32>}, {pipeline_mode = #tpu.pipeline_mode<synchronous>, transform_indices = @transform_9, window_bounds = array<i64: 1, 32>}, {pipeline_mode = #tpu.pipeline_mode<synchronous>, transform_indices = @transform_10, window_bounds = array<i64: 32, 128>}, {pipeline_mode = #tpu.pipeline_mode<synchronous>, transform_indices = @transform_11, window_bounds = array<i64: 1, 128>}, {pipeline_mode = #tpu.pipeline_mode<synchronous>, transform_indices = @transform_12, window_bounds = array<i64: 128, 32>}, {pipeline_mode = #tpu.pipeline_mode<synchronous>, transform_indices = @transform_13, window_bounds = array<i64: 1, 32>}, {transform_indices = @transform_14, window_bounds = array<i64: 16, 32>}]} {
    %c0 = arith.constant 0 : index
    %c0_0 = arith.constant 0 : index
    %0 = vector.load %arg1[%c0, %c0_0] : memref<16x32xf32, #tpu.memory_space<vmem>>, vector<16x32xf32>
    %c0_1 = arith.constant 0 : index
    %c0_2 = arith.constant 0 : index
    %1 = vector.load %arg2[%c0_1, %c0_2] : memref<1x32xf32, #tpu.memory_space<vmem>>, vector<1x32xf32>
    %c0_3 = arith.constant 0 : index
    %c0_4 = arith.constant 0 : index
    %2 = vector.load %arg3[%c0_3, %c0_4] : memref<1x32xf32, #tpu.memory_space<vmem>>, vector<1x32xf32>
    %cst = arith.constant dense<0.000000e+00> : vector<16xf32>
    %3 = vector.multi_reduction <add>, %0, %cst [1] : vector<16x32xf32> to vector<16xf32>
    %4 = vector.shape_cast %3 : vector<16xf32> to vector<16x1xf32>
    %cst_5 = arith.constant 3.200000e+01 : f32
    %5 = vector.broadcast %cst_5 : f32 to vector<16x1xf32>
    %6 = arith.divf %4, %5 : vector<16x1xf32>
    %7 = arith.mulf %0, %0 : vector<16x32xf32>
    %cst_6 = arith.constant dense<0.000000e+00> : vector<16xf32>
    %8 = vector.multi_reduction <add>, %7, %cst_6 [1] : vector<16x32xf32> to vector<16xf32>
    %9 = vector.shape_cast %8 : vector<16xf32> to vector<16x1xf32>
    %cst_7 = arith.constant 3.200000e+01 : f32
    %10 = vector.broadcast %cst_7 : f32 to vector<16x1xf32>
    %11 = arith.divf %9, %10 : vector<16x1xf32>
    %12 = arith.mulf %6, %6 : vector<16x1xf32>
    %13 = arith.subf %11, %12 : vector<16x1xf32>
    %cst_8 = arith.constant 0.000000e+00 : f32
    %14 = vector.broadcast %cst_8 : f32 to vector<16x1xf32>
    %15 = arith.maximumf %13, %14 : vector<16x1xf32>
    %cst_9 = arith.constant 9.99999974E-6 : f32
    %16 = vector.broadcast %cst_9 : f32 to vector<16x1xf32>
    %17 = arith.addf %15, %16 : vector<16x1xf32>
    %18 = math.rsqrt %17 : vector<16x1xf32>
    %19 = vector.broadcast %6 : vector<16x1xf32> to vector<16x32xf32>
    %20 = arith.subf %0, %19 : vector<16x32xf32>
    %21 = vector.broadcast %18 : vector<16x1xf32> to vector<16x32xf32>
    %22 = arith.mulf %20, %21 : vector<16x32xf32>
    %23 = vector.broadcast %1 : vector<1x32xf32> to vector<16x32xf32>
    %24 = arith.mulf %22, %23 : vector<16x32xf32>
    %25 = vector.broadcast %2 : vector<1x32xf32> to vector<16x32xf32>
    %26 = arith.addf %24, %25 : vector<16x32xf32>
    %27 = tpu.iota {dimensions = array<i32: 0>} : vector<8x8xi32>
    %28 = tpu.iota {dimensions = array<i32: 1>} : vector<8x8xi32>
    %29 = arith.cmpi sgt, %28, %27 : vector<8x8xi32>
    %30 = vector.shape_cast %29 : vector<8x8xi1> to vector<1x8x8xi1>
    %cst_10 = arith.constant 0.000000e+00 : f32
    %31 = vector.broadcast %cst_10 : f32 to vector<16x32xf32>
    %c0_11 = arith.constant 0 : index
    %c0_12 = arith.constant 0 : index
    %c0_13 = arith.constant 0 : index
    %32 = vector.load %arg4[%c0_11, %c0_12, %c0_13] : memref<4x32x8xf32, #tpu.memory_space<vmem>>, vector<1x32x8xf32>
    %33 = vector.shape_cast %32 : vector<1x32x8xf32> to vector<32x8xf32>
    %cst_14 = arith.constant dense<0.000000e+00> : vector<16x8xf32>
    %34 = tpu.matmul %26, %33, %cst_14 {dimension_numbers = #tpu.dot_dimension_numbers<[1], [0], [0], [1], [0, 0, 1, 1], [], []>} : vector<16x32xf32>, vector<32x8xf32>, vector<16x8xf32> -> vector<16x8xf32>
    %c0_15 = arith.constant 0 : index
    %c0_16 = arith.constant 0 : index
    %c0_17 = arith.constant 0 : index
    %35 = vector.load %arg5[%c0_15, %c0_16, %c0_17] : memref<4x32x8xf32, #tpu.memory_space<vmem>>, vector<1x32x8xf32>
    %36 = vector.shape_cast %35 : vector<1x32x8xf32> to vector<32x8xf32>
    %cst_18 = arith.constant dense<0.000000e+00> : vector<16x8xf32>
    %37 = tpu.matmul %26, %36, %cst_18 {dimension_numbers = #tpu.dot_dimension_numbers<[1], [0], [0], [1], [0, 0, 1, 1], [], []>} : vector<16x32xf32>, vector<32x8xf32>, vector<16x8xf32> -> vector<16x8xf32>
    %c0_19 = arith.constant 0 : index
    %c0_20 = arith.constant 0 : index
    %c0_21 = arith.constant 0 : index
    %38 = vector.load %arg6[%c0_19, %c0_20, %c0_21] : memref<4x32x8xf32, #tpu.memory_space<vmem>>, vector<1x32x8xf32>
    %39 = vector.shape_cast %38 : vector<1x32x8xf32> to vector<32x8xf32>
    %cst_22 = arith.constant dense<0.000000e+00> : vector<16x8xf32>
    %40 = tpu.matmul %26, %39, %cst_22 {dimension_numbers = #tpu.dot_dimension_numbers<[1], [0], [0], [1], [0, 0, 1, 1], [], []>} : vector<16x32xf32>, vector<32x8xf32>, vector<16x8xf32> -> vector<16x8xf32>
    %41 = vector.shape_cast %34 : vector<16x8xf32> to vector<2x8x8xf32>
    %42 = vector.shape_cast %37 : vector<16x8xf32> to vector<2x8x8xf32>
    %43 = vector.shape_cast %40 : vector<16x8xf32> to vector<2x8x8xf32>
    "tpu.trace_start"() <{level = 10 : i32, message = "bqd,bkd->bqk"}> : () -> ()
    %cst_23 = arith.constant dense<0.000000e+00> : vector<2x8x8xf32>
    %44 = tpu.matmul %41, %42, %cst_23 {dimension_numbers = #tpu.dot_dimension_numbers<[2], [2], [1], [1], [0, 0, 0, 1, 1, 1], [0], [0]>} : vector<2x8x8xf32>, vector<2x8x8xf32>, vector<2x8x8xf32> -> vector<2x8x8xf32>
    "tpu.trace_stop"() : () -> ()
    %cst_24 = arith.constant 0.353553385 : f32
    %45 = vector.broadcast %cst_24 : f32 to vector<2x8x8xf32>
    %46 = arith.mulf %44, %45 : vector<2x8x8xf32>
    %cst_25 = arith.constant -1.000000e+30 : f32
    %47 = vector.shape_cast %30 : vector<1x8x8xi1> to vector<1x8x8xi1>
    %48 = vector.broadcast %47 : vector<1x8x8xi1> to vector<2x8x8xi1>
    %49 = vector.broadcast %cst_25 : f32 to vector<2x8x8xf32>
    %50 = arith.select %48, %49, %46 : vector<2x8x8xi1>, vector<2x8x8xf32>
    %cst_26 = arith.constant dense<0xFF800000> : vector<2x8xf32>
    %51 = vector.multi_reduction <maximumf>, %50, %cst_26 [2] : vector<2x8x8xf32> to vector<2x8xf32>
    %52 = vector.shape_cast %51 : vector<2x8xf32> to vector<2x8x1xf32>
    %53 = vector.broadcast %52 : vector<2x8x1xf32> to vector<2x8x8xf32>
    %54 = arith.subf %50, %53 : vector<2x8x8xf32>
    %55 = math.exp %54 : vector<2x8x8xf32>
    %cst_27 = arith.constant dense<0.000000e+00> : vector<2x8xf32>
    %56 = vector.multi_reduction <add>, %55, %cst_27 [2] : vector<2x8x8xf32> to vector<2x8xf32>
    %57 = vector.shape_cast %56 : vector<2x8xf32> to vector<2x8x1xf32>
    %58 = tpu.reciprocal %57 {approx = true} : vector<2x8x1xf32> -> vector<2x8x1xf32>
    %59 = arith.mulf %57, %58 : vector<2x8x1xf32>
    %cst_28 = arith.constant 2.000000e+00 : f32
    %60 = vector.broadcast %cst_28 : f32 to vector<2x8x1xf32>
    %61 = arith.subf %60, %59 : vector<2x8x1xf32>
    %62 = arith.mulf %58, %61 : vector<2x8x1xf32>
    %63 = vector.broadcast %62 : vector<2x8x1xf32> to vector<2x8x8xf32>
    %64 = arith.mulf %55, %63 : vector<2x8x8xf32>
    "tpu.trace_start"() <{level = 10 : i32, message = "bqk,bkd->bqd"}> : () -> ()
    %cst_29 = arith.constant dense<0.000000e+00> : vector<2x8x8xf32>
    %65 = tpu.matmul %64, %43, %cst_29 {dimension_numbers = #tpu.dot_dimension_numbers<[2], [1], [1], [2], [0, 0, 0, 1, 1, 2], [0], [0]>} : vector<2x8x8xf32>, vector<2x8x8xf32>, vector<2x8x8xf32> -> vector<2x8x8xf32>
    "tpu.trace_stop"() : () -> ()
    %66 = vector.shape_cast %65 : vector<2x8x8xf32> to vector<16x8xf32>
    %c0_30 = arith.constant 0 : index
    %c0_31 = arith.constant 0 : index
    %c0_32 = arith.constant 0 : index
    %67 = vector.load %arg7[%c0_30, %c0_31, %c0_32] : memref<4x8x32xf32, #tpu.memory_space<vmem>>, vector<1x8x32xf32>
    %68 = vector.shape_cast %67 : vector<1x8x32xf32> to vector<8x32xf32>
    %cst_33 = arith.constant dense<0.000000e+00> : vector<16x32xf32>
    %69 = tpu.matmul %66, %68, %cst_33 {dimension_numbers = #tpu.dot_dimension_numbers<[1], [0], [0], [1], [0, 0, 1, 1], [], []>} : vector<16x8xf32>, vector<8x32xf32>, vector<16x32xf32> -> vector<16x32xf32>
    %70 = arith.addf %31, %69 : vector<16x32xf32>
    %c1 = arith.constant 1 : index
    %c0_34 = arith.constant 0 : index
    %c0_35 = arith.constant 0 : index
    %71 = vector.load %arg4[%c1, %c0_34, %c0_35] : memref<4x32x8xf32, #tpu.memory_space<vmem>>, vector<1x32x8xf32>
    %72 = vector.shape_cast %71 : vector<1x32x8xf32> to vector<32x8xf32>
    %cst_36 = arith.constant dense<0.000000e+00> : vector<16x8xf32>
    %73 = tpu.matmul %26, %72, %cst_36 {dimension_numbers = #tpu.dot_dimension_numbers<[1], [0], [0], [1], [0, 0, 1, 1], [], []>} : vector<16x32xf32>, vector<32x8xf32>, vector<16x8xf32> -> vector<16x8xf32>
    %c1_37 = arith.constant 1 : index
    %c0_38 = arith.constant 0 : index
    %c0_39 = arith.constant 0 : index
    %74 = vector.load %arg5[%c1_37, %c0_38, %c0_39] : memref<4x32x8xf32, #tpu.memory_space<vmem>>, vector<1x32x8xf32>
    %75 = vector.shape_cast %74 : vector<1x32x8xf32> to vector<32x8xf32>
    %cst_40 = arith.constant dense<0.000000e+00> : vector<16x8xf32>
    %76 = tpu.matmul %26, %75, %cst_40 {dimension_numbers = #tpu.dot_dimension_numbers<[1], [0], [0], [1], [0, 0, 1, 1], [], []>} : vector<16x32xf32>, vector<32x8xf32>, vector<16x8xf32> -> vector<16x8xf32>
    %c1_41 = arith.constant 1 : index
    %c0_42 = arith.constant 0 : index
    %c0_43 = arith.constant 0 : index
    %77 = vector.load %arg6[%c1_41, %c0_42, %c0_43] : memref<4x32x8xf32, #tpu.memory_space<vmem>>, vector<1x32x8xf32>
    %78 = vector.shape_cast %77 : vector<1x32x8xf32> to vector<32x8xf32>
    %cst_44 = arith.constant dense<0.000000e+00> : vector<16x8xf32>
    %79 = tpu.matmul %26, %78, %cst_44 {dimension_numbers = #tpu.dot_dimension_numbers<[1], [0], [0], [1], [0, 0, 1, 1], [], []>} : vector<16x32xf32>, vector<32x8xf32>, vector<16x8xf32> -> vector<16x8xf32>
    %80 = vector.shape_cast %73 : vector<16x8xf32> to vector<2x8x8xf32>
    %81 = vector.shape_cast %76 : vector<16x8xf32> to vector<2x8x8xf32>
    %82 = vector.shape_cast %79 : vector<16x8xf32> to vector<2x8x8xf32>
    "tpu.trace_start"() <{level = 10 : i32, message = "bqd,bkd->bqk"}> : () -> ()
    %cst_45 = arith.constant dense<0.000000e+00> : vector<2x8x8xf32>
    %83 = tpu.matmul %80, %81, %cst_45 {dimension_numbers = #tpu.dot_dimension_numbers<[2], [2], [1], [1], [0, 0, 0, 1, 1, 1], [0], [0]>} : vector<2x8x8xf32>, vector<2x8x8xf32>, vector<2x8x8xf32> -> vector<2x8x8xf32>
    "tpu.trace_stop"() : () -> ()
    %cst_46 = arith.constant 0.353553385 : f32
    %84 = vector.broadcast %cst_46 : f32 to vector<2x8x8xf32>
    %85 = arith.mulf %83, %84 : vector<2x8x8xf32>
    %cst_47 = arith.constant -1.000000e+30 : f32
    %86 = vector.shape_cast %30 : vector<1x8x8xi1> to vector<1x8x8xi1>
    %87 = vector.broadcast %86 : vector<1x8x8xi1> to vector<2x8x8xi1>
    %88 = vector.broadcast %cst_47 : f32 to vector<2x8x8xf32>
    %89 = arith.select %87, %88, %85 : vector<2x8x8xi1>, vector<2x8x8xf32>
    %cst_48 = arith.constant dense<0xFF800000> : vector<2x8xf32>
    %90 = vector.multi_reduction <maximumf>, %89, %cst_48 [2] : vector<2x8x8xf32> to vector<2x8xf32>
    %91 = vector.shape_cast %90 : vector<2x8xf32> to vector<2x8x1xf32>
    %92 = vector.broadcast %91 : vector<2x8x1xf32> to vector<2x8x8xf32>
    %93 = arith.subf %89, %92 : vector<2x8x8xf32>
    %94 = math.exp %93 : vector<2x8x8xf32>
    %cst_49 = arith.constant dense<0.000000e+00> : vector<2x8xf32>
    %95 = vector.multi_reduction <add>, %94, %cst_49 [2] : vector<2x8x8xf32> to vector<2x8xf32>
    %96 = vector.shape_cast %95 : vector<2x8xf32> to vector<2x8x1xf32>
    %97 = tpu.reciprocal %96 {approx = true} : vector<2x8x1xf32> -> vector<2x8x1xf32>
    %98 = arith.mulf %96, %97 : vector<2x8x1xf32>
    %cst_50 = arith.constant 2.000000e+00 : f32
    %99 = vector.broadcast %cst_50 : f32 to vector<2x8x1xf32>
    %100 = arith.subf %99, %98 : vector<2x8x1xf32>
    %101 = arith.mulf %97, %100 : vector<2x8x1xf32>
    %102 = vector.broadcast %101 : vector<2x8x1xf32> to vector<2x8x8xf32>
    %103 = arith.mulf %94, %102 : vector<2x8x8xf32>
    "tpu.trace_start"() <{level = 10 : i32, message = "bqk,bkd->bqd"}> : () -> ()
    %cst_51 = arith.constant dense<0.000000e+00> : vector<2x8x8xf32>
    %104 = tpu.matmul %103, %82, %cst_51 {dimension_numbers = #tpu.dot_dimension_numbers<[2], [1], [1], [2], [0, 0, 0, 1, 1, 2], [0], [0]>} : vector<2x8x8xf32>, vector<2x8x8xf32>, vector<2x8x8xf32> -> vector<2x8x8xf32>
    "tpu.trace_stop"() : () -> ()
    %105 = vector.shape_cast %104 : vector<2x8x8xf32> to vector<16x8xf32>
    %c1_52 = arith.constant 1 : index
    %c0_53 = arith.constant 0 : index
    %c0_54 = arith.constant 0 : index
    %106 = vector.load %arg7[%c1_52, %c0_53, %c0_54] : memref<4x8x32xf32, #tpu.memory_space<vmem>>, vector<1x8x32xf32>
    %107 = vector.shape_cast %106 : vector<1x8x32xf32> to vector<8x32xf32>
    %cst_55 = arith.constant dense<0.000000e+00> : vector<16x32xf32>
    %108 = tpu.matmul %105, %107, %cst_55 {dimension_numbers = #tpu.dot_dimension_numbers<[1], [0], [0], [1], [0, 0, 1, 1], [], []>} : vector<16x8xf32>, vector<8x32xf32>, vector<16x32xf32> -> vector<16x32xf32>
    %109 = arith.addf %70, %108 : vector<16x32xf32>
    %c2 = arith.constant 2 : index
    %c0_56 = arith.constant 0 : index
    %c0_57 = arith.constant 0 : index
    %110 = vector.load %arg4[%c2, %c0_56, %c0_57] : memref<4x32x8xf32, #tpu.memory_space<vmem>>, vector<1x32x8xf32>
    %111 = vector.shape_cast %110 : vector<1x32x8xf32> to vector<32x8xf32>
    %cst_58 = arith.constant dense<0.000000e+00> : vector<16x8xf32>
    %112 = tpu.matmul %26, %111, %cst_58 {dimension_numbers = #tpu.dot_dimension_numbers<[1], [0], [0], [1], [0, 0, 1, 1], [], []>} : vector<16x32xf32>, vector<32x8xf32>, vector<16x8xf32> -> vector<16x8xf32>
    %c2_59 = arith.constant 2 : index
    %c0_60 = arith.constant 0 : index
    %c0_61 = arith.constant 0 : index
    %113 = vector.load %arg5[%c2_59, %c0_60, %c0_61] : memref<4x32x8xf32, #tpu.memory_space<vmem>>, vector<1x32x8xf32>
    %114 = vector.shape_cast %113 : vector<1x32x8xf32> to vector<32x8xf32>
    %cst_62 = arith.constant dense<0.000000e+00> : vector<16x8xf32>
    %115 = tpu.matmul %26, %114, %cst_62 {dimension_numbers = #tpu.dot_dimension_numbers<[1], [0], [0], [1], [0, 0, 1, 1], [], []>} : vector<16x32xf32>, vector<32x8xf32>, vector<16x8xf32> -> vector<16x8xf32>
    %c2_63 = arith.constant 2 : index
    %c0_64 = arith.constant 0 : index
    %c0_65 = arith.constant 0 : index
    %116 = vector.load %arg6[%c2_63, %c0_64, %c0_65] : memref<4x32x8xf32, #tpu.memory_space<vmem>>, vector<1x32x8xf32>
    %117 = vector.shape_cast %116 : vector<1x32x8xf32> to vector<32x8xf32>
    %cst_66 = arith.constant dense<0.000000e+00> : vector<16x8xf32>
    %118 = tpu.matmul %26, %117, %cst_66 {dimension_numbers = #tpu.dot_dimension_numbers<[1], [0], [0], [1], [0, 0, 1, 1], [], []>} : vector<16x32xf32>, vector<32x8xf32>, vector<16x8xf32> -> vector<16x8xf32>
    %119 = vector.shape_cast %112 : vector<16x8xf32> to vector<2x8x8xf32>
    %120 = vector.shape_cast %115 : vector<16x8xf32> to vector<2x8x8xf32>
    %121 = vector.shape_cast %118 : vector<16x8xf32> to vector<2x8x8xf32>
    "tpu.trace_start"() <{level = 10 : i32, message = "bqd,bkd->bqk"}> : () -> ()
    %cst_67 = arith.constant dense<0.000000e+00> : vector<2x8x8xf32>
    %122 = tpu.matmul %119, %120, %cst_67 {dimension_numbers = #tpu.dot_dimension_numbers<[2], [2], [1], [1], [0, 0, 0, 1, 1, 1], [0], [0]>} : vector<2x8x8xf32>, vector<2x8x8xf32>, vector<2x8x8xf32> -> vector<2x8x8xf32>
    "tpu.trace_stop"() : () -> ()
    %cst_68 = arith.constant 0.353553385 : f32
    %123 = vector.broadcast %cst_68 : f32 to vector<2x8x8xf32>
    %124 = arith.mulf %122, %123 : vector<2x8x8xf32>
    %cst_69 = arith.constant -1.000000e+30 : f32
    %125 = vector.shape_cast %30 : vector<1x8x8xi1> to vector<1x8x8xi1>
    %126 = vector.broadcast %125 : vector<1x8x8xi1> to vector<2x8x8xi1>
    %127 = vector.broadcast %cst_69 : f32 to vector<2x8x8xf32>
    %128 = arith.select %126, %127, %124 : vector<2x8x8xi1>, vector<2x8x8xf32>
    %cst_70 = arith.constant dense<0xFF800000> : vector<2x8xf32>
    %129 = vector.multi_reduction <maximumf>, %128, %cst_70 [2] : vector<2x8x8xf32> to vector<2x8xf32>
    %130 = vector.shape_cast %129 : vector<2x8xf32> to vector<2x8x1xf32>
    %131 = vector.broadcast %130 : vector<2x8x1xf32> to vector<2x8x8xf32>
    %132 = arith.subf %128, %131 : vector<2x8x8xf32>
    %133 = math.exp %132 : vector<2x8x8xf32>
    %cst_71 = arith.constant dense<0.000000e+00> : vector<2x8xf32>
    %134 = vector.multi_reduction <add>, %133, %cst_71 [2] : vector<2x8x8xf32> to vector<2x8xf32>
    %135 = vector.shape_cast %134 : vector<2x8xf32> to vector<2x8x1xf32>
    %136 = tpu.reciprocal %135 {approx = true} : vector<2x8x1xf32> -> vector<2x8x1xf32>
    %137 = arith.mulf %135, %136 : vector<2x8x1xf32>
    %cst_72 = arith.constant 2.000000e+00 : f32
    %138 = vector.broadcast %cst_72 : f32 to vector<2x8x1xf32>
    %139 = arith.subf %138, %137 : vector<2x8x1xf32>
    %140 = arith.mulf %136, %139 : vector<2x8x1xf32>
    %141 = vector.broadcast %140 : vector<2x8x1xf32> to vector<2x8x8xf32>
    %142 = arith.mulf %133, %141 : vector<2x8x8xf32>
    "tpu.trace_start"() <{level = 10 : i32, message = "bqk,bkd->bqd"}> : () -> ()
    %cst_73 = arith.constant dense<0.000000e+00> : vector<2x8x8xf32>
    %143 = tpu.matmul %142, %121, %cst_73 {dimension_numbers = #tpu.dot_dimension_numbers<[2], [1], [1], [2], [0, 0, 0, 1, 1, 2], [0], [0]>} : vector<2x8x8xf32>, vector<2x8x8xf32>, vector<2x8x8xf32> -> vector<2x8x8xf32>
    "tpu.trace_stop"() : () -> ()
    %144 = vector.shape_cast %143 : vector<2x8x8xf32> to vector<16x8xf32>
    %c2_74 = arith.constant 2 : index
    %c0_75 = arith.constant 0 : index
    %c0_76 = arith.constant 0 : index
    %145 = vector.load %arg7[%c2_74, %c0_75, %c0_76] : memref<4x8x32xf32, #tpu.memory_space<vmem>>, vector<1x8x32xf32>
    %146 = vector.shape_cast %145 : vector<1x8x32xf32> to vector<8x32xf32>
    %cst_77 = arith.constant dense<0.000000e+00> : vector<16x32xf32>
    %147 = tpu.matmul %144, %146, %cst_77 {dimension_numbers = #tpu.dot_dimension_numbers<[1], [0], [0], [1], [0, 0, 1, 1], [], []>} : vector<16x8xf32>, vector<8x32xf32>, vector<16x32xf32> -> vector<16x32xf32>
    %148 = arith.addf %109, %147 : vector<16x32xf32>
    %c3 = arith.constant 3 : index
    %c0_78 = arith.constant 0 : index
    %c0_79 = arith.constant 0 : index
    %149 = vector.load %arg4[%c3, %c0_78, %c0_79] : memref<4x32x8xf32, #tpu.memory_space<vmem>>, vector<1x32x8xf32>
    %150 = vector.shape_cast %149 : vector<1x32x8xf32> to vector<32x8xf32>
    %cst_80 = arith.constant dense<0.000000e+00> : vector<16x8xf32>
    %151 = tpu.matmul %26, %150, %cst_80 {dimension_numbers = #tpu.dot_dimension_numbers<[1], [0], [0], [1], [0, 0, 1, 1], [], []>} : vector<16x32xf32>, vector<32x8xf32>, vector<16x8xf32> -> vector<16x8xf32>
    %c3_81 = arith.constant 3 : index
    %c0_82 = arith.constant 0 : index
    %c0_83 = arith.constant 0 : index
    %152 = vector.load %arg5[%c3_81, %c0_82, %c0_83] : memref<4x32x8xf32, #tpu.memory_space<vmem>>, vector<1x32x8xf32>
    %153 = vector.shape_cast %152 : vector<1x32x8xf32> to vector<32x8xf32>
    %cst_84 = arith.constant dense<0.000000e+00> : vector<16x8xf32>
    %154 = tpu.matmul %26, %153, %cst_84 {dimension_numbers = #tpu.dot_dimension_numbers<[1], [0], [0], [1], [0, 0, 1, 1], [], []>} : vector<16x32xf32>, vector<32x8xf32>, vector<16x8xf32> -> vector<16x8xf32>
    %c3_85 = arith.constant 3 : index
    %c0_86 = arith.constant 0 : index
    %c0_87 = arith.constant 0 : index
    %155 = vector.load %arg6[%c3_85, %c0_86, %c0_87] : memref<4x32x8xf32, #tpu.memory_space<vmem>>, vector<1x32x8xf32>
    %156 = vector.shape_cast %155 : vector<1x32x8xf32> to vector<32x8xf32>
    %cst_88 = arith.constant dense<0.000000e+00> : vector<16x8xf32>
    %157 = tpu.matmul %26, %156, %cst_88 {dimension_numbers = #tpu.dot_dimension_numbers<[1], [0], [0], [1], [0, 0, 1, 1], [], []>} : vector<16x32xf32>, vector<32x8xf32>, vector<16x8xf32> -> vector<16x8xf32>
    %158 = vector.shape_cast %151 : vector<16x8xf32> to vector<2x8x8xf32>
    %159 = vector.shape_cast %154 : vector<16x8xf32> to vector<2x8x8xf32>
    %160 = vector.shape_cast %157 : vector<16x8xf32> to vector<2x8x8xf32>
    "tpu.trace_start"() <{level = 10 : i32, message = "bqd,bkd->bqk"}> : () -> ()
    %cst_89 = arith.constant dense<0.000000e+00> : vector<2x8x8xf32>
    %161 = tpu.matmul %158, %159, %cst_89 {dimension_numbers = #tpu.dot_dimension_numbers<[2], [2], [1], [1], [0, 0, 0, 1, 1, 1], [0], [0]>} : vector<2x8x8xf32>, vector<2x8x8xf32>, vector<2x8x8xf32> -> vector<2x8x8xf32>
    "tpu.trace_stop"() : () -> ()
    %cst_90 = arith.constant 0.353553385 : f32
    %162 = vector.broadcast %cst_90 : f32 to vector<2x8x8xf32>
    %163 = arith.mulf %161, %162 : vector<2x8x8xf32>
    %cst_91 = arith.constant -1.000000e+30 : f32
    %164 = vector.shape_cast %30 : vector<1x8x8xi1> to vector<1x8x8xi1>
    %165 = vector.broadcast %164 : vector<1x8x8xi1> to vector<2x8x8xi1>
    %166 = vector.broadcast %cst_91 : f32 to vector<2x8x8xf32>
    %167 = arith.select %165, %166, %163 : vector<2x8x8xi1>, vector<2x8x8xf32>
    %cst_92 = arith.constant dense<0xFF800000> : vector<2x8xf32>
    %168 = vector.multi_reduction <maximumf>, %167, %cst_92 [2] : vector<2x8x8xf32> to vector<2x8xf32>
    %169 = vector.shape_cast %168 : vector<2x8xf32> to vector<2x8x1xf32>
    %170 = vector.broadcast %169 : vector<2x8x1xf32> to vector<2x8x8xf32>
    %171 = arith.subf %167, %170 : vector<2x8x8xf32>
    %172 = math.exp %171 : vector<2x8x8xf32>
    %cst_93 = arith.constant dense<0.000000e+00> : vector<2x8xf32>
    %173 = vector.multi_reduction <add>, %172, %cst_93 [2] : vector<2x8x8xf32> to vector<2x8xf32>
    %174 = vector.shape_cast %173 : vector<2x8xf32> to vector<2x8x1xf32>
    %175 = tpu.reciprocal %174 {approx = true} : vector<2x8x1xf32> -> vector<2x8x1xf32>
    %176 = arith.mulf %174, %175 : vector<2x8x1xf32>
    %cst_94 = arith.constant 2.000000e+00 : f32
    %177 = vector.broadcast %cst_94 : f32 to vector<2x8x1xf32>
    %178 = arith.subf %177, %176 : vector<2x8x1xf32>
    %179 = arith.mulf %175, %178 : vector<2x8x1xf32>
    %180 = vector.broadcast %179 : vector<2x8x1xf32> to vector<2x8x8xf32>
    %181 = arith.mulf %172, %180 : vector<2x8x8xf32>
    "tpu.trace_start"() <{level = 10 : i32, message = "bqk,bkd->bqd"}> : () -> ()
    %cst_95 = arith.constant dense<0.000000e+00> : vector<2x8x8xf32>
    %182 = tpu.matmul %181, %160, %cst_95 {dimension_numbers = #tpu.dot_dimension_numbers<[2], [1], [1], [2], [0, 0, 0, 1, 1, 2], [0], [0]>} : vector<2x8x8xf32>, vector<2x8x8xf32>, vector<2x8x8xf32> -> vector<2x8x8xf32>
    "tpu.trace_stop"() : () -> ()
    %183 = vector.shape_cast %182 : vector<2x8x8xf32> to vector<16x8xf32>
    %c3_96 = arith.constant 3 : index
    %c0_97 = arith.constant 0 : index
    %c0_98 = arith.constant 0 : index
    %184 = vector.load %arg7[%c3_96, %c0_97, %c0_98] : memref<4x8x32xf32, #tpu.memory_space<vmem>>, vector<1x8x32xf32>
    %185 = vector.shape_cast %184 : vector<1x8x32xf32> to vector<8x32xf32>
    %cst_99 = arith.constant dense<0.000000e+00> : vector<16x32xf32>
    %186 = tpu.matmul %183, %185, %cst_99 {dimension_numbers = #tpu.dot_dimension_numbers<[1], [0], [0], [1], [0, 0, 1, 1], [], []>} : vector<16x8xf32>, vector<8x32xf32>, vector<16x32xf32> -> vector<16x32xf32>
    %187 = arith.addf %148, %186 : vector<16x32xf32>
    %c0_100 = arith.constant 0 : index
    %c0_101 = arith.constant 0 : index
    %188 = vector.load %arg8[%c0_100, %c0_101] : memref<1x32xf32, #tpu.memory_space<vmem>>, vector<1x32xf32>
    %189 = vector.broadcast %188 : vector<1x32xf32> to vector<16x32xf32>
    %190 = arith.addf %187, %189 : vector<16x32xf32>
    %191 = arith.addf %190, %0 : vector<16x32xf32>
    %c0_102 = arith.constant 0 : index
    %c0_103 = arith.constant 0 : index
    %192 = vector.load %arg9[%c0_102, %c0_103] : memref<1x32xf32, #tpu.memory_space<vmem>>, vector<1x32xf32>
    %c0_104 = arith.constant 0 : index
    %c0_105 = arith.constant 0 : index
    %193 = vector.load %arg10[%c0_104, %c0_105] : memref<1x32xf32, #tpu.memory_space<vmem>>, vector<1x32xf32>
    %cst_106 = arith.constant dense<0.000000e+00> : vector<16xf32>
    %194 = vector.multi_reduction <add>, %191, %cst_106 [1] : vector<16x32xf32> to vector<16xf32>
    %195 = vector.shape_cast %194 : vector<16xf32> to vector<16x1xf32>
    %cst_107 = arith.constant 3.200000e+01 : f32
    %196 = vector.broadcast %cst_107 : f32 to vector<16x1xf32>
    %197 = arith.divf %195, %196 : vector<16x1xf32>
    %198 = arith.mulf %191, %191 : vector<16x32xf32>
    %cst_108 = arith.constant dense<0.000000e+00> : vector<16xf32>
    %199 = vector.multi_reduction <add>, %198, %cst_108 [1] : vector<16x32xf32> to vector<16xf32>
    %200 = vector.shape_cast %199 : vector<16xf32> to vector<16x1xf32>
    %cst_109 = arith.constant 3.200000e+01 : f32
    %201 = vector.broadcast %cst_109 : f32 to vector<16x1xf32>
    %202 = arith.divf %200, %201 : vector<16x1xf32>
    %203 = arith.mulf %197, %197 : vector<16x1xf32>
    %204 = arith.subf %202, %203 : vector<16x1xf32>
    %cst_110 = arith.constant 0.000000e+00 : f32
    %205 = vector.broadcast %cst_110 : f32 to vector<16x1xf32>
    %206 = arith.maximumf %204, %205 : vector<16x1xf32>
    %cst_111 = arith.constant 9.99999974E-6 : f32
    %207 = vector.broadcast %cst_111 : f32 to vector<16x1xf32>
    %208 = arith.addf %206, %207 : vector<16x1xf32>
    %209 = math.rsqrt %208 : vector<16x1xf32>
    %210 = vector.broadcast %197 : vector<16x1xf32> to vector<16x32xf32>
    %211 = arith.subf %191, %210 : vector<16x32xf32>
    %212 = vector.broadcast %209 : vector<16x1xf32> to vector<16x32xf32>
    %213 = arith.mulf %211, %212 : vector<16x32xf32>
    %214 = vector.broadcast %192 : vector<1x32xf32> to vector<16x32xf32>
    %215 = arith.mulf %213, %214 : vector<16x32xf32>
    %216 = vector.broadcast %193 : vector<1x32xf32> to vector<16x32xf32>
    %217 = arith.addf %215, %216 : vector<16x32xf32>
    %c0_112 = arith.constant 0 : index
    %c0_113 = arith.constant 0 : index
    %218 = vector.load %arg12[%c0_112, %c0_113] : memref<1x128xf32, #tpu.memory_space<vmem>>, vector<1x128xf32>
    %cst_114 = arith.constant 0.000000e+00 : f32
    %219 = vector.broadcast %cst_114 : f32 to vector<16x32xf32>
    %c0_115 = arith.constant 0 : index
    %c0_116 = arith.constant 0 : index
    %220 = vector.load %arg11[%c0_115, %c0_116] : memref<32x128xf32, #tpu.memory_space<vmem>>, vector<32x128xf32>
    %cst_117 = arith.constant dense<0.000000e+00> : vector<16x128xf32>
    %221 = tpu.matmul %217, %220, %cst_117 {dimension_numbers = #tpu.dot_dimension_numbers<[1], [0], [0], [1], [0, 0, 1, 1], [], []>} : vector<16x32xf32>, vector<32x128xf32>, vector<16x128xf32> -> vector<16x128xf32>
    %222 = vector.broadcast %218 : vector<1x128xf32> to vector<16x128xf32>
    %223 = arith.addf %221, %222 : vector<16x128xf32>
    %cst_118 = arith.constant 0.636619746 : f32
    %224 = math.sqrt %cst_118 : f32
    %cst_119 = arith.constant 5.000000e-01 : f32
    %225 = vector.broadcast %cst_119 : f32 to vector<16x128xf32>
    %226 = arith.mulf %225, %223 : vector<16x128xf32>
    %cst_120 = arith.constant 4.471500e-02 : f32
    %227 = vector.broadcast %cst_120 : f32 to vector<16x128xf32>
    %228 = arith.mulf %227, %223 : vector<16x128xf32>
    %229 = arith.mulf %228, %223 : vector<16x128xf32>
    %230 = arith.mulf %229, %223 : vector<16x128xf32>
    %231 = arith.addf %223, %230 : vector<16x128xf32>
    %232 = vector.broadcast %224 : f32 to vector<16x128xf32>
    %233 = arith.mulf %232, %231 : vector<16x128xf32>
    %234 = math.tanh %233 : vector<16x128xf32>
    %cst_121 = arith.constant 1.000000e+00 : f32
    %235 = vector.broadcast %cst_121 : f32 to vector<16x128xf32>
    %236 = arith.addf %235, %234 : vector<16x128xf32>
    %237 = arith.mulf %226, %236 : vector<16x128xf32>
    %c0_122 = arith.constant 0 : index
    %c0_123 = arith.constant 0 : index
    %238 = vector.load %arg13[%c0_122, %c0_123] : memref<128x32xf32, #tpu.memory_space<vmem>>, vector<128x32xf32>
    %cst_124 = arith.constant dense<0.000000e+00> : vector<16x32xf32>
    %239 = tpu.matmul %237, %238, %cst_124 {dimension_numbers = #tpu.dot_dimension_numbers<[1], [0], [0], [1], [0, 0, 1, 1], [], []>} : vector<16x128xf32>, vector<128x32xf32>, vector<16x32xf32> -> vector<16x32xf32>
    %240 = arith.addf %219, %239 : vector<16x32xf32>
    %c0_125 = arith.constant 0 : index
    %c0_126 = arith.constant 0 : index
    %241 = vector.load %arg14[%c0_125, %c0_126] : memref<1x32xf32, #tpu.memory_space<vmem>>, vector<1x32xf32>
    %242 = vector.broadcast %241 : vector<1x32xf32> to vector<16x32xf32>
    %243 = arith.addf %240, %242 : vector<16x32xf32>
    %244 = arith.addf %243, %191 : vector<16x32xf32>
    %c0_127 = arith.constant 0 : index
    %c0_128 = arith.constant 0 : index
    %245 = vector.load %arg15[%c0_127, %c0_128] : memref<16x32xf32, #tpu.memory_space<vmem>>, vector<16x32xf32>
    tpu.vector_store %arg15[%c0_127, %c0_128], %244 {strides = array<i32>} : memref<16x32xf32, #tpu.memory_space<vmem>>, vector<16x32xf32>,
    return
  }
  func.func @transform_0(%arg0: i32) -> (i32, i32) {
    %c0_i32 = arith.constant 0 : i32
    %c0_i32_0 = arith.constant 0 : i32
    return %arg0, %c0_i32 : i32, i32
  }
  func.func @transform_1(%arg0: i32) -> (i32, i32) {
    %c0_i32 = arith.constant 0 : i32
    %c0_i32_0 = arith.constant 0 : i32
    %c0_i32_1 = arith.constant 0 : i32
    return %c0_i32, %c0_i32_0 : i32, i32
  }
  func.func @transform_2(%arg0: i32) -> (i32, i32) {
    %c0_i32 = arith.constant 0 : i32
    %c0_i32_0 = arith.constant 0 : i32
    %c0_i32_1 = arith.constant 0 : i32
    return %c0_i32, %c0_i32_0 : i32, i32
  }
  func.func @transform_3(%arg0: i32) -> (i32, i32, i32) {
    %c0_i32 = arith.constant 0 : i32
    %c0_i32_0 = arith.constant 0 : i32
    %c0_i32_1 = arith.constant 0 : i32
    %c0_i32_2 = arith.constant 0 : i32
    return %c0_i32, %c0_i32_0, %c0_i32_1 : i32, i32, i32
  }
  func.func @transform_4(%arg0: i32) -> (i32, i32, i32) {
    %c0_i32 = arith.constant 0 : i32
    %c0_i32_0 = arith.constant 0 : i32
    %c0_i32_1 = arith.constant 0 : i32
    %c0_i32_2 = arith.constant 0 : i32
    return %c0_i32, %c0_i32_0, %c0_i32_1 : i32, i32, i32
  }
  func.func @transform_5(%arg0: i32) -> (i32, i32, i32) {
    %c0_i32 = arith.constant 0 : i32
    %c0_i32_0 = arith.constant 0 : i32
    %c0_i32_1 = arith.constant 0 : i32
    %c0_i32_2 = arith.constant 0 : i32
    return %c0_i32, %c0_i32_0, %c0_i32_1 : i32, i32, i32
  }
  func.func @transform_6(%arg0: i32) -> (i32, i32, i32) {
    %c0_i32 = arith.constant 0 : i32
    %c0_i32_0 = arith.constant 0 : i32
    %c0_i32_1 = arith.constant 0 : i32
    %c0_i32_2 = arith.constant 0 : i32
    return %c0_i32, %c0_i32_0, %c0_i32_1 : i32, i32, i32
  }
  func.func @transform_7(%arg0: i32) -> (i32, i32) {
    %c0_i32 = arith.constant 0 : i32
    %c0_i32_0 = arith.constant 0 : i32
    %c0_i32_1 = arith.constant 0 : i32
    return %c0_i32, %c0_i32_0 : i32, i32
  }
  func.func @transform_8(%arg0: i32) -> (i32, i32) {
    %c0_i32 = arith.constant 0 : i32
    %c0_i32_0 = arith.constant 0 : i32
    %c0_i32_1 = arith.constant 0 : i32
    return %c0_i32, %c0_i32_0 : i32, i32
  }
  func.func @transform_9(%arg0: i32) -> (i32, i32) {
    %c0_i32 = arith.constant 0 : i32
    %c0_i32_0 = arith.constant 0 : i32
    %c0_i32_1 = arith.constant 0 : i32
    return %c0_i32, %c0_i32_0 : i32, i32
  }
  func.func @transform_10(%arg0: i32) -> (i32, i32) {
    %c0_i32 = arith.constant 0 : i32
    %c0_i32_0 = arith.constant 0 : i32
    %c0_i32_1 = arith.constant 0 : i32
    return %c0_i32, %c0_i32_0 : i32, i32
  }
  func.func @transform_11(%arg0: i32) -> (i32, i32) {
    %c0_i32 = arith.constant 0 : i32
    %c0_i32_0 = arith.constant 0 : i32
    %c0_i32_1 = arith.constant 0 : i32
    return %c0_i32, %c0_i32_0 : i32, i32
  }
  func.func @transform_12(%arg0: i32) -> (i32, i32) {
    %c0_i32 = arith.constant 0 : i32
    %c0_i32_0 = arith.constant 0 : i32
    %c0_i32_1 = arith.constant 0 : i32
    return %c0_i32, %c0_i32_0 : i32, i32
  }
  func.func @transform_13(%arg0: i32) -> (i32, i32) {
    %c0_i32 = arith.constant 0 : i32
    %c0_i32_0 = arith.constant 0 : i32
    %c0_i32_1 = arith.constant 0 : i32
    return %c0_i32, %c0_i32_0 : i32, i32
  }
  func.func @transform_14(%arg0: i32) -> (i32, i32) {
    %c0_i32 = arith.constant 0 : i32
    %c0_i32_0 = arith.constant 0 : i32
    return %arg0, %c0_i32 : i32, i32
  }
}

</mosaic_0001>

<bundles_post_ra>
// kernel: transformer_block.1
= control target key start
LH: loop header
LB: loop body
LE: loop exit
PB: predicated region body
PF: predicated region fallthrough
CT: control target
= control target key end

     0   :  { %vm52_vm0 = vcmask 261120   ;;  %s4303_s0 = inlined_call_operand.vmem [shape: f32[16,32], index: 0, kind: input, shape index: {}]   ;;  %s4304_s1 = inlined_call_operand.vmem [shape: f32[1,32], index: 1, kind: input, shape index: {}]   ;;  %s4305_s2 = inlined_call_operand.vmem [shape: f32[1,32], index: 2, kind: input, shape index: {}]   ;;  %s4306_s3 = inlined_call_operand.vmem [shape: f32[4,32,8], index: 3, kind: input, shape index: {}]   ;;  %s4307_s4 = inlined_call_operand.vmem [shape: f32[4,32,8], index: 4, kind: input, shape index: {}]   ;;  %s4308_s5 = inlined_call_operand.vmem [shape: f32[4,32,8], index: 5, kind: input, shape index: {}]   ;;  %s4309_s6 = inlined_call_operand.vmem [shape: f32[4,8,32], index: 6, kind: input, shape index: {}]   ;;  %s4310_s7 = inlined_call_operand.vmem [shape: f32[1,32], index: 7, kind: input, shape index: {}]   ;;  %s4311_s8 = inlined_call_operand.vmem [shape: f32[1,32], index: 8, kind: input, shape index: {}]   ;;  %s4312_s9 = inlined_call_operand.vmem [shape: f32[1,32], index: 9, kind: input, shape index: {}]   ;;  %s4313_s10 = inlined_call_operand.vmem [shape: f32[32,128], index: 10, kind: input, shape index: {}]   ;;  %s4314_s11 = inlined_call_operand.vmem [shape: f32[1,128], index: 11, kind: input, shape index: {}]   ;;  %s4315_s12 = inlined_call_operand.vmem [shape: f32[128,32], index: 12, kind: input, shape index: {}]   ;;  %s4316_s13 = inlined_call_operand.vmem [shape: f32[1,32], index: 13, kind: input, shape index: {}]   ;;  %s4317_s14 = inlined_call_operand.hbm [shape: f32[16,32], index: 14, kind: output, shape index: {}]  }
   0x1   :  { %v3837_v0 = vld [vmem:[%s4303_s0] sm:$0xff]  ;;  %v3842_v1 = vld [vmem:[%s4303_s0 + $0x8] sm:$0xff] }
   0x2   :  { %19 = vsyncpa [#allocation3], 0  ;;  %v53_v2 = vsel %vm52_vm0, %v3837_v0, 0.0  ;;  %v62_v3 = vmul.f32 %v3837_v0, %v3837_v0  ;;  %v63_v4 = vmul.f32 %v3842_v1, %v3842_v1  ;;  %v56_v6 = vsel %vm52_vm0, %v3842_v1, 0.0  ;;  %v107_v8 = vld [vmem:[%s4306_s3] sm:$0xff]  ;;  %v108_v9 = vld [vmem:[%s4306_s3 + $0x8] sm:$0xff] }
   0x3   :  { %54 = vadd.xlane.f32.xlu0 %v53_v2  ;;  %v3539_v10 = vpack.c.bf16 %v108_v9, %v107_v8  ;;  %v109_v11 = vld [vmem:[%s4306_s3 + $0x10] sm:$0xff]  ;;  %v110_v12 = vld [vmem:[%s4306_s3 + $0x18] sm:$0xff]  ;;  %v192_v14 = vld [vmem:[%s4307_s4] sm:$0xff]  ;;  %v3754_v54 = vmov 0.0   ;;  %vm3755_vm1 = vmmov 0   ;;  %vm350_vm2 = vcmask 64512  }
   0x4   :  { %v64_v5 = vsel %vm52_vm0, %v62_v3, 0.0  ;;  %v67_v7 = vsel %vm52_vm0, %v63_v4, 0.0  ;;  %v3543_v13 = vpack.c.bf16 %v110_v12, %v109_v11  ;;  %v193_v15 = vld [vmem:[%s4307_s4 + $0x8] sm:$0xff]  ;;  %v3017_v35 = vld [vmem:[%s4304_s1] ss:$0 sm:$0xff]  ;;  %v194_v43 = vld [vmem:[%s4307_s4 + $0x10] sm:$0xff]  ;;  %3304 = vmatprep.subr.mxu0 %v3754_v54  ;;  %3306 = vmatprep.mubr.msk.f32.mxu0 %vm3755_vm1, %v3754_v54  ;;  %v102_v61 = vlaneseq }
   0x5   :  { %65 = vadd.xlane.f32.xlu1 %v64_v5  ;;  %3540 = vmatprep.subr.bf16.mxu1 %v3539_v10  ;;  %v3547_v16 = vpack.c.bf16 %v193_v15, %v192_v14  ;;  %v3018_v37 = vld [vmem:[%s4305_s2] ss:$0 sm:$0xff]  ;;  %v195_v44 = vld [vmem:[%s4307_s4 + $0x18] sm:$0xff]  ;;  %v272_v49 = vld [vmem:[%s4308_s5 + $0x8] sm:$0xff]  ;;  %s3756_s22 = smov [#allocation2]  }
   0x6   :  { %3542 = vmatpush3.bf16.msra.mxu1 %v3539_v10  ;;  %v3551_v47 = vpack.c.bf16 %v195_v44, %v194_v43  ;;  %v271_v48 = vld [vmem:[%s4308_s5] sm:$0xff]  ;;  %v273_v51 = vld [vmem:[%s4308_s5 + $0x10] sm:$0xff]  ;;  %v274_v52 = vld [vmem:[%s4308_s5 + $0x18] sm:$0xff]  ;;  %v103_v62 = vshrl.u32 %v102_v61, 7  ;;  %v105_v63 = vand.u32 127, %v102_v61 }
   0x7   :  { %57 = vadd.xlane.f32.xlu0 %v56_v6  ;;  %3544 = vmatprep.subr.bf16.mxu1 %v3543_v13  ;;  %v3555_v50 = vpack.c.bf16 %v272_v49, %v271_v48  ;;  %v3559_v53 = vpack.c.bf16 %v274_v52, %v273_v51  ;;  %v3039_v43 = vld [vmem:[%s4307_s4 + $0x30] sm:$0xff]  ;;  %v3040_v44 = vld [vmem:[%s4307_s4 + $0x38] sm:$0xff]  ;;  %v3044_v48 = vld [vmem:[%s4308_s5 + $0x28] sm:$0xff] }
   0x8   :  { %vm3930_vm3 = vcmp.gt.s32.totalorder %v105_v63, %v103_v62  ;;  %v3045_v52 = vld [vmem:[%s4308_s5 + $0x30] sm:$0xff] }
   0x9   :  { %68 = vadd.xlane.f32.xlu1 %v67_v7 }
   0xa   :  { %3546 = vmatpush3.bf16.msra.mxu1 %v3543_v13 }
   0xb   :  { %3548 = vmatprep.subr.bf16.mxu1 %v3547_v16 }
  0x90   :  { %v55_v17 = vpop.xlane.xlu0 %54 }
  0x91   :  { %v60_v18 = vmul.f32 0.03125, %v55_v17 }
  0x92   :  { %v66_v19 = vpop.xlane.xlu1 %65 }
  0x93   :  { %v72_v20 = vmul.f32 %v60_v18, %v60_v18  ;;  %v70_v21 = vmul.f32 0.03125, %v66_v19  ;;  %v82_v33 = vsub.f32 %v3837_v0, %v60_v18 }
  0x94   :  { %v58_v22 = vpop.xlane.xlu0 %57 }
  0x95   :  { %v74_v23 = vsub.f32 %v70_v21, %v72_v20  ;;  %v61_v24 = vmul.f32 0.03125, %v58_v22 }
  0x96   :  { %v69_v25 = vpop.xlane.xlu1 %68 }
  0x97   :  { %v76_v26 = vmax.f32 %v74_v23, 0.0  ;;  %v73_v27 = vmul.f32 %v61_v24, %v61_v24  ;;  %v71_v28 = vmul.f32 0.03125, %v69_v25  ;;  %v83_v39 = vsub.f32 %v3842_v1, %v61_v24  ;;  %v3031_v23 = vld [vmem:[%s4306_s3 + $0x20] sm:$0xff]  ;;  %v3032_v24 = vld [vmem:[%s4306_s3 + $0x28] sm:$0xff] }
  0x98   :  { %v3563_v25 = vpack.c.bf16 %v3032_v24, %v3031_v23 }
  0x99   :  { %v78_v29 = vadd.f32 1e-05, %v76_v26  ;;  %v75_v30 = vsub.f32 %v71_v28, %v73_v27  ;;  %v3037_v26 = vld [vmem:[%s4307_s4 + $0x20] sm:$0xff]  ;;  %v3038_v27 = vld [vmem:[%s4307_s4 + $0x28] sm:$0xff] }
  0x9a   :  { %v3571_v28 = vpack.c.bf16 %v3038_v27, %v3037_v26  ;;  %v3061_v26 = vld [vmem:[%s4306_s3 + $0x48] sm:$0xff] }
  0x9b   :  { %3686 = vrsqrt.f32 %v78_v29  ;;  %v77_v31 = vmax.f32 %v75_v30, 0.0 }
  0x9d   :  { %v79_v32 = vadd.f32 1e-05, %v77_v31 }
  0x9f   :  { %3688 = vrsqrt.f32 %v79_v32 }
  0xa5   :  { %v3687_v34 = vpop.eup %3686 }
  0xa6   :  { %v84_v36 = vmul.f32 %v3687_v34, %v82_v33 }
  0xa8   :  { %v92_v38 = vmul.f32 %v3017_v35, %v84_v36  ;;  %v3034_v36 = vld [vmem:[%s4306_s3 + $0x38] sm:$0xff] }
  0xa9   :  { %v3689_v40 = vpop.eup %3688 }
  0xaa   :  { %v3880_v41 = vadd.f32 %v3018_v37, %v92_v38  ;;  %v85_v42 = vmul.f32 %v3689_v40, %v83_v39 }
  0xac   :  { %v93_v45 = vmul.f32 %v3017_v35, %v85_v42  ;;  %3269 = vmatprep.mubr.msk.f32.mxu1 %vm52_vm0, %v3880_v41  ;;  %v3033_v35 = vld [vmem:[%s4306_s3 + $0x30] sm:$0xff] }
  0xad   :  { %v3567_v42 = vpack.c.bf16 %v3034_v36, %v3033_v35 }
  0xae   :  { %v3890_v46 = vadd.f32 %v3018_v37, %v93_v45 }
  0xb0   :  { %3270 = vmatmul.mubr.msk.f32.vlgmr.msra.gmra.mrb[0].mxu1 %vm52_vm0, %v3890_v46 }
  0xb1   :  { %3550 = vmatpush3.bf16.msra.mxu1 %v3547_v16  ;;  %3280 = vmatprep.mubr.msk.f32.mxu1 %vm52_vm0, %v3880_v41 }
  0xb2   :  { %3552 = vmatprep.subr.bf16.mxu1 %v3551_v47 }
  0xb5   :  { %3554 = vmatpush3.bf16.msra.mxu1 %v3551_v47  ;;  %v3043_v47 = vld [vmem:[%s4308_s5 + $0x20] sm:$0xff] }
  0xb6   :  { %3556 = vmatprep.subr.bf16.mxu1 %v3555_v50  ;;  %v3579_v51 = vpack.c.bf16 %v3044_v48, %v3043_v47  ;;  %v3074_v48 = vld [vmem:[%s4308_s5 + $0x50] sm:$0xff] }
  0xb8   :  { %3281 = vmatmul.mubr.msk.f32.vlgmr.msra.gmra.mrb[2].mxu1 %vm52_vm0, %v3890_v46 }
  0xb9   :  { %3558 = vmatpush3.bf16.msra.mxu1 %v3555_v50  ;;  %3291 = vmatprep.mubr.msk.f32.mxu1 %vm52_vm0, %v3880_v41  ;;  %v3575_v50 = vpack.c.bf16 %v3040_v44, %v3039_v43  ;;  %v3072_v44 = vld [vmem:[%s4308_s5 + $0x40] sm:$0xff] }
  0xba   :  { %3560 = vmatprep.subr.bf16.mxu1 %v3559_v53 }
  0xbd   :  { %3562 = vmatpush3.bf16.msra.mxu1 %v3559_v53  ;;  %v3046_v53 = vld [vmem:[%s4308_s5 + $0x38] sm:$0xff] }
  0xbe   :  { %3294 = vmatprep.subr.mxu1 %v3754_v54 }
  0xc0   :  { %3292 = vmatmul.mubr.msk.f32.vlgmr.msra.gmra.mrb[4].mxu1 %vm52_vm0, %v3890_v46 }
  0xc1   :  { %3296 = vmatprep.mubr.msk.f32.mxu1 %vm3755_vm1, %v3754_v54 }
 0x183   :  { %v3271_v55 = vpop.f32.mrb[0].mxu1 }
 0x184   :  { %v183_v56 = vpop.f32.mrb[1].mxu1 }
 0x18b   :  { %v3282_v57 = vpop.f32.mrb[2].mxu1 }
 0x18c   :  { %v262_v58 = vpop.f32.mrb[3].mxu1 }
 0x18d   :  { %3295 = vmatpush3.xpose.msk.msra.mxu1 %vm350_vm2, %v262_v58 }
 0x18e   :  { %3299 = vmatprep.subr.mxu1 %v3754_v54 }
 0x190   :  { %3297 = vmatmul.mubr.msk.f32.vlgmr.msra.gmra.mrb[6].mxu1 %vm350_vm2, %v183_v56 }
 0x191   :  { %3300 = vmatpush3.xpose.msk.msra.mxu1 %vm350_vm2, %v3282_v57  ;;  %3301 = vmatprep.mubr.msk.f32.mxu1 %vm3755_vm1, %v3754_v54 }
 0x192   :  { %3309 = vmatprep.subr.mxu1 %v3754_v54 }
 0x193   :  { %v3293_v59 = vpop.f32.mrb[4].mxu1 }
 0x194   :  { %v341_v60 = vpop.f32.mrb[5].mxu1  ;;  %3302 = vmatmul.mubr.msk.f32.vlgmr.msra.gmra.mrb[8].mxu1 %vm350_vm2, %v3271_v55  ;;  %v3583_v55 = vpack.c.bf16 %v3046_v53, %v3045_v52  ;;  %v683_v52 = vld [vmem:[%s4309_s6] sm:$0xff] }
 0x195   :  { %3305 = vmatpush3.msra.mxu0 %v341_v60  ;;  %3310 = vmatpush3.msra.mxu1 %v3293_v59 }
 0x196   :  { %3311 = vmatprep.mubr.msk.f32.mxu1 %vm3755_vm1, %v3754_v54  ;;  %3564 = vmatprep.subr.bf16.mxu0 %v3563_v25 }
 0x197   :  { %3572 = vmatprep.subr.bf16.mxu1 %v3571_v28 }
 0x263   :  { %v423_v2 = vpop.f32.mrb[6].mxu1 }
 0x264   :  { %v503_v4 = vmul.f32 0.35355338, %v423_v2  ;;  %v3298_v5 = vpop.f32.mrb[7].mxu1 }
 0x266   :  { %v507_v6 = vsel %vm3930_vm3, -1e+30, %v503_v4 }
 0x267   :  { %v499_v7 = vpop.f32.mrb[8].mxu1  ;;  %v509_v8 = vsel %vm350_vm2, %v507_v6, -inf }
 0x268   :  { %v504_v9 = vmul.f32 0.35355338, %v499_v7  ;;  %510 = vmax.xlane.f32.xlu1 %v509_v8  ;;  %v3303_v10 = vpop.f32.mrb[9].mxu1 }
 0x26a   :  { %v508_v11 = vsel %vm3930_vm3, -1e+30, %v504_v9 }
 0x26b   :  { %v512_v12 = vsel %vm350_vm2, %v508_v11, -inf }
 0x26c   :  { %513 = vmax.xlane.f32.xlu0 %v512_v12 }
 0x2f5   :  { %v511_v13 = vpop.xlane.xlu1 %510 }
 0x2f6   :  { %v515_v14 = vsub.f32 %v507_v6, %v511_v13 }
 0x2f8   :  { %v517_v15 = vmul.f32 1.442695, %v515_v14 }
 0x2f9   :  { %v514_v16 = vpop.xlane.xlu0 %513 }
 0x2fa   :  { %3690 = vpow2.f32 %v517_v15  ;;  %v516_v17 = vsub.f32 %v508_v11, %v514_v16 }
 0x2fc   :  { %v519_v18 = vmul.f32 1.442695, %v516_v17 }
 0x2fe   :  { %3692 = vpow2.f32 %v519_v18 }
 0x304   :  { %v3691_v19 = vpop.eup %3690 }
 0x305   :  { %v521_v20 = vsel %vm350_vm2, %v3691_v19, 0.0 }
 0x306   :  { %522 = vadd.xlane.f32.xlu1 %v521_v20 }
 0x308   :  { %v3693_v21 = vpop.eup %3692 }
 0x309   :  { %v524_v22 = vsel %vm350_vm2, %v3693_v21, 0.0 }
 0x30a   :  { %525 = vadd.xlane.f32.xlu0 %v524_v22 }
 0x393   :  { %v523_v29 = vpop.xlane.xlu1 %522 }
 0x394   :  { %3694 = vrcp.f32 %v523_v29 }
 0x397   :  { %v526_v30 = vpop.xlane.xlu0 %525 }
 0x398   :  { %3696 = vrcp.f32 %v526_v30 }
 0x39e   :  { %v3695_v31 = vpop.eup %3694 }
 0x39f   :  { %v529_v32 = vmul.f32 %v3695_v31, %v523_v29 }
 0x3a1   :  { %v531_v33 = vsub.f32 2.0, %v529_v32 }
 0x3a2   :  { %v3697_v34 = vpop.eup %3696 }
 0x3a3   :  { %v533_v37 = vmul.f32 %v3695_v31, %v531_v33  ;;  %v530_v38 = vmul.f32 %v3697_v34, %v526_v30 }
 0x3a5   :  { %v535_v39 = vmul.f32 %v3691_v19, %v533_v37  ;;  %v532_v40 = vsub.f32 2.0, %v530_v38  ;;  %v3062_v38 = vld [vmem:[%s4306_s3 + $0x50] sm:$0xff] }
 0x3a7   :  { %v534_v45 = vmul.f32 %v3697_v34, %v532_v40  ;;  %3307 = vmatmul.mubr.msk.f32.vlgmr.msra.gmra.mrb[0].mxu0 %vm350_vm2, %v535_v39  ;;  %v3063_v39 = vld [vmem:[%s4306_s3 + $0x58] sm:$0xff] }
 0x3a8   :  { %3566 = vmatpush3.bf16.msra.mxu0 %v3563_v25  ;;  %3322 = vmatprep.mubr.msk.f32.mxu0 %vm52_vm0, %v3880_v41  ;;  %v3060_v25 = vld [vmem:[%s4306_s3 + $0x40] sm:$0xff]  ;;  %v3591_v43 = vpack.c.bf16 %v3063_v39, %v3062_v38 }
 0x3a9   :  { %v536_v49 = vmul.f32 %v3693_v21, %v534_v45  ;;  %3568 = vmatprep.subr.bf16.mxu0 %v3567_v42  ;;  %v3587_v27 = vpack.c.bf16 %v3061_v26, %v3060_v25  ;;  %v3073_v45 = vld [vmem:[%s4308_s5 + $0x48] sm:$0xff] }
 0x3aa   :  { %v3603_v47 = vpack.c.bf16 %v3073_v45, %v3072_v44 }
 0x3ab   :  { %3312 = vmatmul.mubr.msk.f32.vlgmr.msra.gmra.mrb[10].mxu1 %vm350_vm2, %v536_v49  ;;  %v3075_v49 = vld [vmem:[%s4308_s5 + $0x58] sm:$0xff] }
 0x3ac   :  { %3570 = vmatpush3.bf16.msra.mxu0 %v3567_v42  ;;  %3574 = vmatpush3.bf16.msra.mxu1 %v3571_v28 }
 0x3ad   :  { %3333 = vmatprep.mubr.msk.f32.mxu1 %vm52_vm0, %v3880_v41  ;;  %3576 = vmatprep.subr.bf16.mxu1 %v3575_v50 }
 0x3ae   :  { %3580 = vmatprep.subr.bf16.mxu0 %v3579_v51 }
 0x3af   :  { %3323 = vmatmul.mubr.msk.f32.vlgmr.msra.gmra.mrb[2].mxu0 %vm52_vm0, %v3890_v46 }
 0x3b0   :  { %3578 = vmatpush3.bf16.msra.mxu1 %v3575_v50  ;;  %3582 = vmatpush3.bf16.msra.mxu0 %v3579_v51  ;;  %v3607_v50 = vpack.c.bf16 %v3075_v49, %v3074_v48  ;;  %v3055_v51 = vld [vmem:[%s4309_s6 + $0x8] sm:$0xff] }
 0x3b1   :  { %3344 = vmatprep.mubr.msk.f32.mxu0 %vm52_vm0, %v3880_v41  ;;  %3584 = vmatprep.subr.bf16.mxu0 %v3583_v55 }
 0x3b2   :  { %3347 = vmatprep.subr.mxu1 %v3754_v54 }
 0x3b3   :  { %3334 = vmatmul.mubr.msk.f32.vlgmr.msra.gmra.mrb[12].mxu1 %vm52_vm0, %v3890_v46 }
 0x3b4   :  { %3586 = vmatpush3.bf16.msra.mxu0 %v3583_v55  ;;  %3349 = vmatprep.mubr.msk.f32.mxu1 %vm3755_vm1, %v3754_v54  ;;  %v3066_v55 = vld [vmem:[%s4307_s4 + $0x40] sm:$0xff] }
 0x3b5   :  { %3357 = vmatprep.subr.mxu0 %v3754_v54 }
 0x3b7   :  { %3345 = vmatmul.mubr.msk.f32.vlgmr.msra.gmra.mrb[4].mxu0 %vm52_vm0, %v3890_v46 }
 0x3b8   :  { %3359 = vmatprep.mubr.msk.f32.mxu0 %vm3755_vm1, %v3754_v54 }
 0x47a   :  { %v3998_v56 = vpop.f32.mrb[0].mxu0 }
 0x47b   :  { %v3308_v57 = vpop.f32.mrb[1].mxu0 }
 0x47c   :  { %v3067_v57 = vld [vmem:[%s4307_s4 + $0x48] sm:$0xff] }
 0x47e   :  { %v4000_v58 = vpop.f32.mrb[10].mxu1 }
 0x47f   :  { %v3313_v59 = vpop.f32.mrb[11].mxu1 }
 0x482   :  { %v3324_v60 = vpop.f32.mrb[2].mxu0 }
 0x483   :  { %v755_v61 = vpop.f32.mrb[3].mxu0 }
 0x486   :  { %v3335_v62 = vpop.f32.mrb[12].mxu1 }
 0x487   :  { %v835_v63 = vpop.f32.mrb[13].mxu1 }
 0x488   :  { %3348 = vmatpush3.xpose.msk.msra.mxu1 %vm350_vm2, %v835_v63  ;;  %v3068_v63 = vld [vmem:[%s4307_s4 + $0x50] sm:$0xff] }
 0x489   :  { %3352 = vmatprep.subr.mxu1 %v3754_v54 }
 0x48a   :  { %v3346_v2 = vpop.f32.mrb[4].mxu0 }
 0x48b   :  { %v915_v4 = vpop.f32.mrb[5].mxu0  ;;  %3350 = vmatmul.mubr.msk.f32.vlgmr.msra.gmra.mrb[14].mxu1 %vm350_vm2, %v755_v61 }
 0x48c   :  { %3353 = vmatpush3.xpose.msk.msra.mxu1 %vm350_vm2, %v3335_v62  ;;  %3358 = vmatpush3.msra.mxu0 %v915_v4 }
 0x48d   :  { %3354 = vmatprep.mubr.msk.f32.mxu1 %vm3755_vm1, %v3754_v54  ;;  %3362 = vmatprep.subr.mxu1 %v3754_v54 }
 0x48e   :  { %3367 = vmatprep.subr.mxu0 %v3055_v51 }
 0x48f   :  { %3355 = vmatmul.mubr.msk.f32.vlgmr.msra.gmra.mrb[16].mxu1 %vm350_vm2, %v3324_v60  ;;  %v3595_v60 = vpack.c.bf16 %v3067_v57, %v3066_v55  ;;  %v3102_v55 = vld [vmem:[%s4308_s5 + $0x78] sm:$0xff] }
 0x490   :  { %3363 = vmatpush3.msra.mxu1 %v3346_v2  ;;  %3364 = vmatprep.mubr.msk.f32.mxu1 %vm3755_vm1, %v3754_v54  ;;  %v3069_v2 = vld [vmem:[%s4307_s4 + $0x58] sm:$0xff] }
 0x491   :  { %3588 = vmatprep.subr.bf16.mxu1 %v3587_v27  ;;  %v3599_v4 = vpack.c.bf16 %v3069_v2, %v3068_v63  ;;  %v3096_v63 = vld [vmem:[%s4307_s4 + $0x78] sm:$0xff] }
 0x55e   :  { %v996_v5 = vpop.f32.mrb[14].mxu1 }
 0x55f   :  { %v1076_v6 = vmul.f32 0.35355338, %v996_v5  ;;  %v3351_v7 = vpop.f32.mrb[15].mxu1 }
 0x561   :  { %v1078_v8 = vsel %vm3930_vm3, -1e+30, %v1076_v6 }
 0x562   :  { %v1072_v9 = vpop.f32.mrb[16].mxu1  ;;  %v1080_v10 = vsel %vm350_vm2, %v1078_v8, -inf }
 0x563   :  { %v1077_v11 = vmul.f32 0.35355338, %v1072_v9  ;;  %1081 = vmax.xlane.f32.xlu0 %v1080_v10  ;;  %v3356_v12 = vpop.f32.mrb[17].mxu1 }
 0x565   :  { %v1079_v13 = vsel %vm3930_vm3, -1e+30, %v1077_v11 }
 0x566   :  { %v1083_v14 = vsel %vm350_vm2, %v1079_v13, -inf }
 0x567   :  { %1084 = vmax.xlane.f32.xlu1 %v1083_v14 }
 0x5f0   :  { %v1082_v15 = vpop.xlane.xlu0 %1081 }
 0x5f1   :  { %v1086_v16 = vsub.f32 %v1078_v8, %v1082_v15 }
 0x5f3   :  { %v1088_v17 = vmul.f32 1.442695, %v1086_v16 }
 0x5f4   :  { %v1085_v18 = vpop.xlane.xlu1 %1084 }
 0x5f5   :  { %3698 = vpow2.f32 %v1088_v17  ;;  %v1087_v19 = vsub.f32 %v1079_v13, %v1085_v18 }
 0x5f7   :  { %v1090_v20 = vmul.f32 1.442695, %v1087_v19 }
 0x5f9   :  { %3700 = vpow2.f32 %v1090_v20 }
 0x5ff   :  { %v3699_v21 = vpop.eup %3698 }
 0x600   :  { %v1092_v22 = vsel %vm350_vm2, %v3699_v21, 0.0 }
 0x601   :  { %1093 = vadd.xlane.f32.xlu0 %v1092_v22 }
 0x603   :  { %v3701_v23 = vpop.eup %3700 }
 0x604   :  { %v1095_v24 = vsel %vm350_vm2, %v3701_v23, 0.0 }
 0x605   :  { %1096 = vadd.xlane.f32.xlu1 %v1095_v24 }
 0x68e   :  { %v1094_v28 = vpop.xlane.xlu0 %1093 }
 0x68f   :  { %3702 = vrcp.f32 %v1094_v28 }
 0x692   :  { %v1097_v29 = vpop.xlane.xlu1 %1096 }
 0x693   :  { %3704 = vrcp.f32 %v1097_v29 }
 0x699   :  { %v3703_v30 = vpop.eup %3702 }
 0x69a   :  { %v1100_v31 = vmul.f32 %v3703_v30, %v1094_v28 }
 0x69c   :  { %v1102_v32 = vsub.f32 2.0, %v1100_v31 }
 0x69d   :  { %v3705_v33 = vpop.eup %3704 }
 0x69e   :  { %v1104_v34 = vmul.f32 %v3703_v30, %v1102_v32  ;;  %v1101_v35 = vmul.f32 %v3705_v33, %v1097_v29  ;;  %v3087_v29 = vld [vmem:[%s4306_s3 + $0x60] sm:$0xff]  ;;  %v3088_v30 = vld [vmem:[%s4306_s3 + $0x68] sm:$0xff]  ;;  %v3084_v32 = vld [vmem:[%s4309_s6 + $0x10] sm:$0xff] }
 0x69f   :  { %v3611_v31 = vpack.c.bf16 %v3088_v30, %v3087_v29 }
 0x6a0   :  { %v1106_v36 = vmul.f32 %v3699_v21, %v1104_v34  ;;  %v1103_v37 = vsub.f32 2.0, %v1101_v35 }
 0x6a2   :  { %v1105_v40 = vmul.f32 %v3705_v33, %v1103_v37  ;;  %3360 = vmatmul.mubr.msk.f32.vlgmr.msra.gmra.mrb[6].mxu0 %vm350_vm2, %v1106_v36 }
 0x6a3   :  { %3368 = vmatpush3.msra.mxu0 %v3055_v51  ;;  %v3100_v51 = vld [vmem:[%s4308_s5 + $0x68] sm:$0xff] }
 0x6a4   :  { %v1107_v42 = vmul.f32 %v3701_v23, %v1105_v40  ;;  %3372 = vmatprep.subr.mxu0 %v683_v52 }
 0x6a6   :  { %3365 = vmatmul.mubr.msk.f32.vlgmr.msra.gmra.mrb[18].mxu1 %vm350_vm2, %v1107_v42  ;;  %v3089_v42 = vld [vmem:[%s4306_s3 + $0x70] sm:$0xff] }
 0x6a7   :  { %3590 = vmatpush3.bf16.msra.mxu1 %v3587_v27  ;;  %3385 = vmatprep.mubr.msk.f32.mxu1 %vm52_vm0, %v3880_v41 }
 0x6a8   :  { %3592 = vmatprep.subr.bf16.mxu1 %v3591_v43 }
 0x6ab   :  { %3594 = vmatpush3.bf16.msra.mxu1 %v3591_v43  ;;  %v3090_v43 = vld [vmem:[%s4306_s3 + $0x78] sm:$0xff] }
 0x6ac   :  { %3604 = vmatprep.subr.bf16.mxu1 %v3603_v47  ;;  %v3615_v48 = vpack.c.bf16 %v3090_v43, %v3089_v42 }
 0x6ae   :  { %3386 = vmatmul.mubr.msk.f32.vlgmr.msra.gmra.mrb[20].mxu1 %vm52_vm0, %v3890_v46 }
 0x6af   :  { %3606 = vmatpush3.bf16.msra.mxu1 %v3603_v47  ;;  %3407 = vmatprep.mubr.msk.f32.mxu1 %vm52_vm0, %v3880_v41 }
 0x6b0   :  { %3608 = vmatprep.subr.bf16.mxu1 %v3607_v50 }
 0x6b3   :  { %3610 = vmatpush3.bf16.msra.mxu1 %v3607_v50  ;;  %v3099_v50 = vld [vmem:[%s4308_s5 + $0x60] sm:$0xff] }
 0x6b4   :  { %3415 = vmatprep.subr.mxu1 %v3754_v54 }
 0x6b6   :  { %3408 = vmatmul.mubr.msk.f32.vlgmr.msra.gmra.mrb[22].mxu1 %vm52_vm0, %v3890_v46 }
 0x6b7   :  { %3417 = vmatprep.mubr.msk.f32.mxu1 %vm3755_vm1, %v3754_v54 }
 0x775   :  { %v1177_v53 = vpop.f32.mrb[6].mxu0 }
 0x776   :  { %v3361_v59 = vpop.f32.mrb[7].mxu0  ;;  %3369 = vmatprep.mubr.msk.f32.mxu0 %vm350_vm2, %v1177_v53  ;;  %v3101_v53 = vld [vmem:[%s4308_s5 + $0x70] sm:$0xff] }
 0x777   :  { %v3631_v57 = vpack.c.bf16 %v3102_v55, %v3101_v53  ;;  %v3093_v59 = vld [vmem:[%s4307_s4 + $0x60] sm:$0xff] }
 0x779   :  { %v1250_v61 = vpop.f32.mrb[18].mxu1 }
 0x77a   :  { %v3366_v62 = vpop.f32.mrb[19].mxu1  ;;  %3370 = vmatmul.mubr.msk.f32.vlgmr.msra.gmra.mrb[8].mxu0 %vm350_vm2, %v1250_v61 }
 0x77b   :  { %3373 = vmatpush3.msra.mxu0 %v683_v52  ;;  %3374 = vmatprep.mubr.msk.f32.mxu0 %vm350_vm2, %v3998_v56  ;;  %v3627_v52 = vpack.c.bf16 %v3100_v51, %v3099_v50  ;;  %v3095_v62 = vld [vmem:[%s4307_s4 + $0x70] sm:$0xff] }
 0x77c   :  { %3596 = vmatprep.subr.bf16.mxu0 %v3595_v60 }
 0x781   :  { %v3387_v5 = vpop.f32.mrb[20].mxu1 }
 0x782   :  { %v1489_v6 = vpop.f32.mrb[21].mxu1  ;;  %3375 = vmatmul.mubr.msk.f32.vlgmr.msra.gmra.mrb[8].mxu0 %vm350_vm2, %v4000_v58 }
 0x783   :  { %3598 = vmatpush3.bf16.msra.mxu0 %v3595_v60  ;;  %3396 = vmatprep.mubr.msk.f32.mxu0 %vm52_vm0, %v3880_v41  ;;  %v3094_v60 = vld [vmem:[%s4307_s4 + $0x68] sm:$0xff] }
 0x784   :  { %3600 = vmatprep.subr.bf16.mxu0 %v3599_v4  ;;  %v3619_v61 = vpack.c.bf16 %v3094_v60, %v3093_v59 }
 0x787   :  { %3602 = vmatpush3.bf16.msra.mxu0 %v3599_v4 }
 0x788   :  { %3410 = vmatprep.subr.mxu0 %v3754_v54 }
 0x789   :  { %v3409_v56 = vpop.f32.mrb[22].mxu1 }
 0x78a   :  { %3397 = vmatmul.mubr.msk.f32.vlgmr.msra.gmra.mrb[10].mxu0 %vm52_vm0, %v3890_v46  ;;  %v1649_v7 = vpop.f32.mrb[23].mxu1 }
 0x78b   :  { %3412 = vmatprep.mubr.msk.f32.mxu0 %vm3755_vm1, %v3754_v54 }
 0x85d   :  { %v3398_v8 = vpop.f32.mrb[10].mxu0 }
 0x85e   :  { %v1569_v9 = vpop.f32.mrb[11].mxu0  ;;  %3416 = vmatpush3.xpose.msk.msra.mxu1 %vm350_vm2, %v3398_v8 }
 0x85f   :  { %3411 = vmatpush3.xpose.msk.msra.mxu0 %vm350_vm2, %v1569_v9  ;;  %3425 = vmatprep.subr.mxu1 %v3754_v54 }
 0x860   :  { %3420 = vmatprep.subr.mxu0 %v3754_v54 }
 0x861   :  { %3418 = vmatmul.mubr.msk.f32.vlgmr.msra.gmra.mrb[24].mxu1 %vm350_vm2, %v3387_v5 }
 0x862   :  { %3413 = vmatmul.mubr.msk.f32.vlgmr.msra.gmra.mrb[12].mxu0 %vm350_vm2, %v1489_v6  ;;  %3426 = vmatpush3.msra.mxu1 %v3409_v56  ;;  %v3623_v6 = vpack.c.bf16 %v3096_v63, %v3095_v62  ;;  %v2791_v62 = vld [vmem:[%s4313_s10 + $0x8] sm:$0xff]  ;;  %v2792_v63 = vld [vmem:[%s4313_s10 + $0x10] sm:$0xff] }
 0x863   :  { %3421 = vmatpush3.msra.mxu0 %v1649_v7  ;;  %3427 = vmatprep.mubr.msk.f32.mxu1 %vm3755_vm1, %v3754_v54 }
 0x864   :  { %3422 = vmatprep.mubr.msk.f32.mxu0 %vm3755_vm1, %v3754_v54  ;;  %3612 = vmatprep.subr.bf16.mxu1 %v3611_v31 }
 0x865   :  { %3430 = vmatprep.subr.mxu0 %v3084_v32 }
 0x934   :  { %v1806_v58 = vpop.f32.mrb[24].mxu1 }
 0x935   :  { %v1811_v10 = vmul.f32 0.35355338, %v1806_v58  ;;  %v1730_v11 = vpop.f32.mrb[12].mxu0  ;;  %v3419_v12 = vpop.f32.mrb[25].mxu1 }
 0x936   :  { %v1810_v13 = vmul.f32 0.35355338, %v1730_v11  ;;  %v3414_v14 = vpop.f32.mrb[13].mxu0 }
 0x937   :  { %v1813_v15 = vsel %vm3930_vm3, -1e+30, %v1811_v10 }
 0x938   :  { %v1817_v16 = vsel %vm350_vm2, %v1813_v15, -inf  ;;  %v1812_v17 = vsel %vm3930_vm3, -1e+30, %v1810_v13 }
 0x939   :  { %1818 = vmax.xlane.f32.xlu1 %v1817_v16  ;;  %v1814_v18 = vsel %vm350_vm2, %v1812_v17, -inf }
 0x93a   :  { %1815 = vmax.xlane.f32.xlu0 %v1814_v18 }
 0x9c6   :  { %v1819_v19 = vpop.xlane.xlu1 %1818 }
 0x9c7   :  { %v1821_v20 = vsub.f32 %v1813_v15, %v1819_v19  ;;  %v1816_v21 = vpop.xlane.xlu0 %1815 }
 0x9c8   :  { %v1820_v22 = vsub.f32 %v1812_v17, %v1816_v21 }
 0x9c9   :  { %v1824_v23 = vmul.f32 1.442695, %v1821_v20 }
 0x9ca   :  { %v1822_v24 = vmul.f32 1.442695, %v1820_v22 }
 0x9cb   :  { %3706 = vpow2.f32 %v1824_v23 }
 0x9cc   :  { %3708 = vpow2.f32 %v1822_v24 }
 0x9d5   :  { %v3707_v25 = vpop.eup %3706 }
 0x9d6   :  { %v3709_v26 = vpop.eup %3708  ;;  %v1829_v27 = vsel %vm350_vm2, %v3707_v25, 0.0 }
 0x9d7   :  { %1830 = vadd.xlane.f32.xlu1 %v1829_v27  ;;  %v1826_v28 = vsel %vm350_vm2, %v3709_v26, 0.0 }
 0x9d8   :  { %1827 = vadd.xlane.f32.xlu0 %v1826_v28 }
 0xa64   :  { %v1831_v33 = vpop.xlane.xlu1 %1830 }
 0xa65   :  { %3710 = vrcp.f32 %v1831_v33  ;;  %v1828_v34 = vpop.xlane.xlu0 %1827 }
 0xa66   :  { %3712 = vrcp.f32 %v1828_v34 }
 0xa6f   :  { %v3711_v35 = vpop.eup %3710 }
 0xa70   :  { %v3713_v36 = vpop.eup %3712  ;;  %v1835_v37 = vmul.f32 %v3711_v35, %v1831_v33 }
 0xa71   :  { %v1834_v38 = vmul.f32 %v3713_v36, %v1828_v34 }
 0xa72   :  { %v1837_v39 = vsub.f32 2.0, %v1835_v37 }
 0xa73   :  { %v1836_v40 = vsub.f32 2.0, %v1834_v38 }
 0xa74   :  { %v1839_v44 = vmul.f32 %v3711_v35, %v1837_v39 }
 0xa75   :  { %v1838_v45 = vmul.f32 %v3713_v36, %v1836_v40  ;;  %v3111_v40 = vld [vmem:[%s4309_s6 + $0x18] sm:$0xff] }
 0xa76   :  { %v1841_v47 = vmul.f32 %v3707_v25, %v1839_v44 }
 0xa77   :  { %v1840_v49 = vmul.f32 %v3709_v26, %v1838_v45 }
 0xa78   :  { %3428 = vmatmul.mubr.msk.f32.vlgmr.msra.gmra.mrb[26].mxu1 %vm350_vm2, %v1841_v47  ;;  %v3114_v47 = vld [vmem:[%s4310_s7] ss:$0 sm:$0xff] }
 0xa79   :  { %3614 = vmatpush3.bf16.msra.mxu1 %v3611_v31  ;;  %3423 = vmatmul.mubr.msk.f32.vlgmr.msra.gmra.mrb[14].mxu0 %vm350_vm2, %v1840_v49 }
 0xa7a   :  { %3443 = vmatprep.mubr.msk.f32.mxu1 %vm52_vm0, %v3880_v41  ;;  %3616 = vmatprep.subr.bf16.mxu1 %v3615_v48 }
 0xa7b   :  { %3431 = vmatpush3.msra.mxu0 %v3084_v32 }
 0xa7c   :  { %3620 = vmatprep.subr.bf16.mxu0 %v3619_v61 }
 0xa7d   :  { %3618 = vmatpush3.bf16.msra.mxu1 %v3615_v48 }
 0xa7e   :  { %3628 = vmatprep.subr.bf16.mxu1 %v3627_v52 }
 0xa80   :  { %3444 = vmatmul.mubr.msk.f32.vlgmr.msra.gmra.mrb[28].mxu1 %vm52_vm0, %v3890_v46 }
 0xa81   :  { %3630 = vmatpush3.bf16.msra.mxu1 %v3627_v52  ;;  %3465 = vmatprep.mubr.msk.f32.mxu1 %vm52_vm0, %v3880_v41 }
 0xa82   :  { %3632 = vmatprep.subr.bf16.mxu1 %v3631_v57 }
 0xa85   :  { %3634 = vmatpush3.bf16.msra.mxu1 %v3631_v57 }
 0xa86   :  { %3478 = vmatprep.subr.mxu1 %v3754_v54 }
 0xa88   :  { %3466 = vmatmul.mubr.msk.f32.vlgmr.msra.gmra.mrb[30].mxu1 %vm52_vm0, %v3890_v46 }
 0xa89   :  { %3480 = vmatprep.mubr.msk.f32.mxu1 %vm3755_vm1, %v3754_v54 }
 0xb4b   :  { %v1984_v2 = vpop.f32.mrb[26].mxu1 }
 0xb4c   :  { %v1911_v4 = vpop.f32.mrb[14].mxu0  ;;  %v3429_v5 = vpop.f32.mrb[27].mxu1 }
 0xb4d   :  { %v3424_v56 = vpop.f32.mrb[15].mxu0  ;;  %3432 = vmatprep.mubr.msk.f32.mxu0 %vm350_vm2, %v1911_v4  ;;  %v2793_v4 = vld [vmem:[%s4313_s10 + $0x18] sm:$0xff] }
 0xb4e   :  { %3433 = vmatmul.mubr.msk.f32.vlgmr.msra.gmra.mrb[8].mxu0 %vm350_vm2, %v1984_v2  ;;  %v3639_v5 = vpack.c.bf16 %v2793_v4, %v2792_v63  ;;  %v2900_v56 = vld [vmem:[%s4315_s12 + $0x8] sm:$0xff] }
 0xb4f   :  { %3622 = vmatpush3.bf16.msra.mxu0 %v3619_v61  ;;  %3454 = vmatprep.mubr.msk.f32.mxu0 %vm52_vm0, %v3880_v41  ;;  %v2790_v61 = vld [vmem:[%s4313_s10] sm:$0xff] }
 0xb50   :  { %3624 = vmatprep.subr.bf16.mxu0 %v3623_v6  ;;  %v3635_v2 = vpack.c.bf16 %v2791_v62, %v2790_v61 }
 0xb53   :  { %v3445_v7 = vpop.f32.mrb[28].mxu1  ;;  %3626 = vmatpush3.bf16.msra.mxu0 %v3623_v6  ;;  %v2899_v6 = vld [vmem:[%s4315_s12] sm:$0xff] }
 0xb54   :  { %v2144_v8 = vpop.f32.mrb[29].mxu1  ;;  %3468 = vmatprep.subr.mxu0 %v3754_v54 }
 0xb56   :  { %3455 = vmatmul.mubr.msk.f32.vlgmr.msra.gmra.mrb[16].mxu0 %vm52_vm0, %v3890_v46 }
 0xb57   :  { %3470 = vmatprep.mubr.msk.f32.mxu0 %vm3755_vm1, %v3754_v54 }
 0xb5b   :  { %v3467_v9 = vpop.f32.mrb[30].mxu1 }
 0xb5c   :  { %v2304_v58 = vpop.f32.mrb[31].mxu1 }
 0xb5d   :  { %3479 = vmatpush3.msra.mxu1 %v2304_v58 }
 0xb5e   :  { %3636 = vmatprep.subr.bf16.mxu1 %v3635_v2 }
 0xc29   :  { %v3456_v10 = vpop.f32.mrb[16].mxu0 }
 0xc2a   :  { %v2224_v11 = vpop.f32.mrb[17].mxu0 }
 0xc2b   :  { %3469 = vmatpush3.xpose.msk.msra.mxu0 %vm350_vm2, %v2224_v11 }
 0xc2c   :  { %3473 = vmatprep.subr.mxu0 %v3754_v54 }
 0xc2e   :  { %3471 = vmatmul.mubr.msk.f32.vlgmr.msra.gmra.mrb[18].mxu0 %vm350_vm2, %v2144_v8 }
 0xc2f   :  { %3474 = vmatpush3.xpose.msk.msra.mxu0 %vm350_vm2, %v3456_v10  ;;  %3475 = vmatprep.mubr.msk.f32.mxu0 %vm3755_vm1, %v3754_v54 }
 0xc30   :  { %3483 = vmatprep.subr.mxu0 %v3754_v54 }
 0xc32   :  { %3476 = vmatmul.mubr.msk.f32.vlgmr.msra.gmra.mrb[20].mxu0 %vm350_vm2, %v3445_v7  ;;  %v3643_v7 = vpack.c.bf16 %v2900_v56, %v2899_v6 }
 0xc33   :  { %3484 = vmatpush3.msra.mxu0 %v3467_v9  ;;  %3485 = vmatprep.mubr.msk.f32.mxu0 %vm3755_vm1, %v3754_v54 }
 0xc34   :  { %3488 = vmatprep.subr.mxu0 %v3111_v40 }
 0xd01   :  { %v2385_v41 = vpop.f32.mrb[18].mxu0 }
 0xd02   :  { %v2465_v46 = vmul.f32 0.35355338, %v2385_v41  ;;  %v3472_v12 = vpop.f32.mrb[19].mxu0 }
 0xd04   :  { %v2467_v13 = vsel %vm3930_vm3, -1e+30, %v2465_v46 }
 0xd05   :  { %v2461_v14 = vpop.f32.mrb[20].mxu0  ;;  %v2469_v15 = vsel %vm350_vm2, %v2467_v13, -inf }
 0xd06   :  { %v2466_v16 = vmul.f32 0.35355338, %v2461_v14  ;;  %2470 = vmax.xlane.f32.xlu0 %v2469_v15  ;;  %v3477_v17 = vpop.f32.mrb[21].mxu0 }
 0xd08   :  { %v2468_v18 = vsel %vm3930_vm3, -1e+30, %v2466_v16 }
 0xd09   :  { %v2472_v19 = vsel %vm350_vm2, %v2468_v18, -inf }
 0xd0a   :  { %2473 = vmax.xlane.f32.xlu1 %v2472_v19 }
 0xd93   :  { %v2471_v20 = vpop.xlane.xlu0 %2470 }
 0xd94   :  { %v2475_v54 = vsub.f32 %v2467_v13, %v2471_v20 }
 0xd96   :  { %v2477_v21 = vmul.f32 1.442695, %v2475_v54 }
 0xd97   :  { %v2474_v22 = vpop.xlane.xlu1 %2473 }
 0xd98   :  { %3714 = vpow2.f32 %v2477_v21  ;;  %v2476_v23 = vsub.f32 %v2468_v18, %v2474_v22 }
 0xd9a   :  { %v2479_v24 = vmul.f32 1.442695, %v2476_v23  ;;  %v3115_v23 = vld [vmem:[%s4311_s8] ss:$0 sm:$0xff] }
 0xd9c   :  { %3716 = vpow2.f32 %v2479_v24 }
 0xda2   :  { %v3715_v25 = vpop.eup %3714 }
 0xda3   :  { %v2481_v26 = vsel %vm350_vm2, %v3715_v25, 0.0 }
 0xda4   :  { %2482 = vadd.xlane.f32.xlu0 %v2481_v26 }
 0xda6   :  { %v3717_v27 = vpop.eup %3716 }
 0xda7   :  { %v2484_v28 = vsel %vm350_vm2, %v3717_v27, 0.0 }
 0xda8   :  { %2485 = vadd.xlane.f32.xlu1 %v2484_v28 }
 0xe31   :  { %v2483_v3 = vpop.xlane.xlu0 %2482 }
 0xe32   :  { %3718 = vrcp.f32 %v2483_v3 }
 0xe35   :  { %v2486_v29 = vpop.xlane.xlu1 %2485 }
 0xe36   :  { %3720 = vrcp.f32 %v2486_v29 }
 0xe3c   :  { %v3719_v30 = vpop.eup %3718 }
 0xe3d   :  { %v2489_v31 = vmul.f32 %v3719_v30, %v2483_v3 }
 0xe3f   :  { %v2491_v32 = vsub.f32 2.0, %v2489_v31  ;;  %v2901_v31 = vld [vmem:[%s4315_s12 + $0x10] sm:$0xff] }
 0xe40   :  { %v3721_v33 = vpop.eup %3720 }
 0xe41   :  { %v2493_v34 = vmul.f32 %v3719_v30, %v2491_v32  ;;  %v2490_v35 = vmul.f32 %v3721_v33, %v2486_v29  ;;  %v2902_v32 = vld [vmem:[%s4315_s12 + $0x18] sm:$0xff] }
 0xe43   :  { %v2495_v36 = vmul.f32 %v3715_v25, %v2493_v34  ;;  %v2492_v37 = vsub.f32 2.0, %v2490_v35  ;;  %v2903_v34 = vld [vmem:[%s4315_s12 + $0x20] sm:$0xff]  ;;  %v2904_v35 = vld [vmem:[%s4315_s12 + $0x28] sm:$0xff] }
 0xe45   :  { %v2494_v38 = vmul.f32 %v3721_v33, %v2492_v37  ;;  %3481 = vmatmul.mubr.msk.f32.vlgmr.msra.gmra.mrb[32].mxu1 %vm350_vm2, %v2495_v36  ;;  %v3647_v33 = vpack.c.bf16 %v2902_v32, %v2901_v31  ;;  %v3651_v36 = vpack.c.bf16 %v2904_v35, %v2903_v34  ;;  %v2905_v37 = vld [vmem:[%s4315_s12 + $0x30] sm:$0xff] }
 0xe46   :  { %3638 = vmatpush3.bf16.msra.mxu1 %v3635_v2 }
 0xe47   :  { %v2496_v39 = vmul.f32 %v3717_v27, %v2494_v38  ;;  %3640 = vmatprep.subr.bf16.mxu1 %v3639_v5  ;;  %v3116_v27 = vld [vmem:[%s4312_s9] ss:$0 sm:$0xff]  ;;  %v2906_v38 = vld [vmem:[%s4315_s12 + $0x38] sm:$0xff]  ;;  %s3006_s9 = sshll.u32 %s3756_s22, 4  ;;  %s3007_s9 = int_to_ptr.vmem [resolvable:$true] %s3006_s9 }
 0xe48   :  { %s3730_s23 = scalar_lea.vmem %s3007_s9, 256  ;;  %p3735_p1 = scmp.lt.s32.totalorder %s3007_s9, %s3007_s9 }
 0xe49   :  { %3486 = vmatmul.mubr.msk.f32.vlgmr.msra.gmra.mrb[22].mxu0 %vm350_vm2, %v2496_v39  ;;  %v3655_v39 = vpack.c.bf16 %v2906_v38, %v2905_v37  ;;  %p3731_p0 = scmp.ne.s32.totalorder %s3007_s9, %s3730_s23  ;;  %p3736_p2 = scmp.lt.s32.totalorder %s3730_s23, %s3730_s23 }
 0xe4a   :  { %3489 = vmatpush3.msra.mxu0 %v3111_v40  ;;  %3642 = vmatpush3.bf16.msra.mxu1 %v3639_v5  ;;  %v2907_v40 = vld [vmem:[%s4315_s12 + $0x40] sm:$0xff] }
 0xe4b   :  { %3644 = vmatprep.subr.bf16.mxu0 %v3643_v7  ;;  %p3737_p3 = por %p3736_p2, %p3735_p1 }
 0xe4d   :  { %p3738_p4 = pnand %p3737_p3, %p3731_p0 }
 0xf18   :  { %v2566_v42 = vpop.f32.mrb[32].mxu1 }
 0xf19   :  { %v3482_v43 = vpop.f32.mrb[33].mxu1  ;;  %3490 = vmatprep.mubr.msk.f32.mxu0 %vm350_vm2, %v2566_v42  ;;  %v2908_v42 = vld [vmem:[%s4315_s12 + $0x48] sm:$0xff] }
 0xf1a   :  { %v2909_v43 = vld [vmem:[%s4315_s12 + $0x50] sm:$0xff] }
 0xf1c   :  { %v2639_v44 = vpop.f32.mrb[22].mxu0 }
 0xf1d   :  { %v3487_v45 = vpop.f32.mrb[23].mxu0  ;;  %3491 = vmatmul.mubr.msk.f32.vlgmr.msra.gmra.mrb[8].mxu0 %vm350_vm2, %v2639_v44  ;;  %v3659_v44 = vpack.c.bf16 %v2908_v42, %v2907_v40 }
 0xf1e   :  { %3646 = vmatpush3.bf16.msra.mxu0 %v3643_v7  ;;  %v2910_v45 = vld [vmem:[%s4315_s12 + $0x58] sm:$0xff] }
 0xf1f   :  { %3648 = vmatprep.subr.bf16.mxu0 %v3647_v33 }
 0xf22   :  { %3650 = vmatpush3.bf16.msra.mxu0 %v3647_v33 }
 0xf23   :  { %3652 = vmatprep.subr.bf16.mxu0 %v3651_v36 }
 0xf26   :  { %3654 = vmatpush3.bf16.msra.mxu0 %v3651_v36 }
 0xf27   :  { %3656 = vmatprep.subr.bf16.mxu0 %v3655_v39 }
 0xf2a   :  { %3658 = vmatpush3.bf16.msra.mxu0 %v3655_v39 }
 0xf2b   :  { %3660 = vmatprep.subr.bf16.mxu0 %v3659_v44 }
 0xf2e   :  { %3662 = vmatpush3.bf16.msra.mxu0 %v3659_v44 }
 0xff0   :  { %v3492_v48 = vpop.f32.mrb[8].mxu0 }
 0xff1   :  { %v2736_v49 = vadd.f32 %v3492_v48, %v3114_v47  ;;  %v2717_v50 = vpop.f32.mrb[9].mxu0  ;;  %v2911_v48 = vld [vmem:[%s4315_s12 + $0x60] sm:$0xff] }
 0xff2   :  { %v2735_v51 = vadd.f32 %v3114_v47, %v2717_v50  ;;  %v3663_v47 = vpack.c.bf16 %v2910_v45, %v2909_v43 }
 0xff3   :  { %v4196_v52 = vadd.f32 %v2736_v49, %v3842_v1  ;;  %v2912_v49 = vld [vmem:[%s4315_s12 + $0x68] sm:$0xff] }
 0xff4   :  { %v4199_v53 = vadd.f32 %v2735_v51, %v3837_v0  ;;  %3664 = vmatprep.subr.bf16.mxu0 %v3663_v47  ;;  %v3667_v50 = vpack.c.bf16 %v2912_v49, %v2911_v48  ;;  %v2913_v51 = vld [vmem:[%s4315_s12 + $0x70] sm:$0xff] }
 0xff5   :  { %v2744_v55 = vsel %vm52_vm0, %v4196_v52, 0.0  ;;  %v2750_v57 = vmul.f32 %v4196_v52, %v4196_v52  ;;  %3666 = vmatpush3.bf16.msra.mxu0 %v3663_v47 }
 0xff6   :  { %2745 = vadd.xlane.f32.xlu1 %v2744_v55  ;;  %v2741_v59 = vsel %vm52_vm0, %v4199_v53, 0.0  ;;  %v2749_v60 = vmul.f32 %v4199_v53, %v4199_v53  ;;  %v2914_v55 = vld [vmem:[%s4315_s12 + $0x78] sm:$0xff]  ;;  %3668 = vmatprep.subr.bf16.mxu0 %v3667_v50 }
 0xff7   :  { %2742 = vadd.xlane.f32.xlu0 %v2741_v59  ;;  %v2754_v1 = vsel %vm52_vm0, %v2750_v57, 0.0  ;;  %v3671_v57 = vpack.c.bf16 %v2914_v55, %v2913_v51  ;;  %v3117_v59 = vld [vmem:[%s4314_s11] ss:$0 sm:$0xff] }
 0xff8   :  { %v2751_v0 = vsel %vm52_vm0, %v2749_v60, 0.0 }
 0xff9   :  { %3670 = vmatpush3.bf16.msra.mxu0 %v3667_v50 }
 0xffa   :  { %2755 = vadd.xlane.f32.xlu1 %v2754_v1  ;;  %3672 = vmatprep.subr.bf16.mxu0 %v3671_v57 }
 0xffb   :  { %2752 = vadd.xlane.f32.xlu0 %v2751_v0 }
 0xffd   :  { %3674 = vmatpush3.bf16.msra.mxu0 %v3671_v57 }
0x1083   :  { %v2746_v8 = vpop.xlane.xlu1 %2745 }
0x1084   :  { %v2748_v9 = vmul.f32 0.03125, %v2746_v8  ;;  %v2743_v58 = vpop.xlane.xlu0 %2742 }
0x1085   :  { %v2747_v10 = vmul.f32 0.03125, %v2743_v58 }
0x1086   :  { %v2760_v41 = vmul.f32 %v2748_v9, %v2748_v9  ;;  %v2770_v54 = vsub.f32 %v4196_v52, %v2748_v9 }
0x1087   :  { %v2756_v11 = vpop.xlane.xlu1 %2755  ;;  %v2759_v13 = vmul.f32 %v2747_v10, %v2747_v10  ;;  %v2769_v22 = vsub.f32 %v4199_v53, %v2747_v10 }
0x1088   :  { %v2758_v46 = vmul.f32 0.03125, %v2756_v11  ;;  %v2753_v12 = vpop.xlane.xlu0 %2752 }
0x1089   :  { %v2757_v14 = vmul.f32 0.03125, %v2753_v12 }
0x108a   :  { %v2762_v15 = vsub.f32 %v2758_v46, %v2760_v41 }
0x108b   :  { %v2761_v16 = vsub.f32 %v2757_v14, %v2759_v13 }
0x108c   :  { %v2764_v17 = vmax.f32 %v2762_v15, 0.0  ;;  %v3120_v15 = vld [vmem:[%s4316_s13] ss:$0 sm:$0xff] }
0x108d   :  { %v2763_v18 = vmax.f32 %v2761_v16, 0.0 }
0x108e   :  { %v2766_v19 = vadd.f32 1e-05, %v2764_v17 }
0x108f   :  { %v2765_v20 = vadd.f32 1e-05, %v2763_v18 }
0x1090   :  { %3722 = vrsqrt.f32 %v2766_v19 }
0x1091   :  { %3724 = vrsqrt.f32 %v2765_v20 }
0x109a   :  { %v3723_v21 = vpop.eup %3722 }
0x109b   :  { %v3725_v24 = vpop.eup %3724  ;;  %v2772_v25 = vmul.f32 %v3723_v21, %v2770_v54 }
0x109c   :  { %v2771_v26 = vmul.f32 %v3725_v24, %v2769_v22 }
0x109d   :  { %v2780_v28 = vmul.f32 %v3115_v23, %v2772_v25 }
0x109e   :  { %v2779_v3 = vmul.f32 %v3115_v23, %v2771_v26 }
0x109f   :  { %v2788_v30 = vadd.f32 %v3116_v27, %v2780_v28 }
0x10a0   :  { %v2787_v29 = vadd.f32 %v3116_v27, %v2779_v3 }
0x10a2   :  { %3501 = vmatprep.mubr.msk.f32.mxu1 %vm52_vm0, %v2787_v29 }
0x10a3   :  { %3502 = vmatmul.mubr.msk.f32.vlgmr.msra.gmra.mrb[34].mxu1 %vm52_vm0, %v2788_v30 }
0x1176   :  { %v3503_v60 = vpop.f32.mrb[34].mxu1 }
0x1177   :  { %v2878_v1 = vadd.f32 %v3503_v60, %v3117_v59  ;;  %v2872_v0 = vpop.f32.mrb[35].mxu1 }
0x1178   :  { %v2873_v61 = vadd.f32 %v3117_v59, %v2872_v0 }
0x1179   :  { %v2884_v62 = vmul.f32 0.044715, %v2878_v1  ;;  %v2882_v12 = vmul.f32 0.5, %v2878_v1 }
0x117a   :  { %v2883_v63 = vmul.f32 0.044715, %v2873_v61  ;;  %v2881_v41 = vmul.f32 0.5, %v2873_v61 }
0x117b   :  { %v2886_v2 = vmul.f32 %v2884_v62, %v2878_v1 }
0x117c   :  { %v2885_v4 = vmul.f32 %v2883_v63, %v2873_v61 }
0x117d   :  { %v2888_v5 = vmul.f32 %v2886_v2, %v2878_v1 }
0x117e   :  { %v2887_v6 = vmul.f32 %v2885_v4, %v2873_v61 }
0x117f   :  { %v2890_v56 = vadd.f32 %v2888_v5, %v2878_v1 }
0x1180   :  { %v2889_v7 = vadd.f32 %v2887_v6, %v2873_v61 }
0x1181   :  { %v2892_v8 = vmul.f32 0.7978845, %v2890_v56 }
0x1182   :  { %v2891_v9 = vmul.f32 0.7978845, %v2889_v7 }
0x1183   :  { %3726 = vtanh.f32 %v2892_v8 }
0x1184   :  { %3728 = vtanh.f32 %v2891_v9 }
0x118d   :  { %v3727_v58 = vpop.eup %3726 }
0x118e   :  { %v3729_v10 = vpop.eup %3728  ;;  %v2896_v11 = vadd.f32 1.0, %v3727_v58 }
0x118f   :  { %v2895_v46 = vadd.f32 1.0, %v3729_v10 }
0x1190   :  { %v2898_v14 = vmul.f32 %v2896_v11, %v2882_v12 }
0x1191   :  { %v2897_v13 = vmul.f32 %v2895_v46, %v2881_v41 }
0x1193   :  { %3536 = vmatprep.mubr.f32.mxu0 %v2897_v13 }
0x1194   :  { %3537 = vmatmul.mubr.f32.vlgmr.msra.gmra.mrb[24].mxu0 %v2898_v14 }
0x1267   :  { %v3538_v16 = vpop.f32.mrb[24].mxu0 }
0x1268   :  { %v2994_v17 = vadd.f32 %v3538_v16, %v3120_v15  ;;  %v2988_v18 = vpop.f32.mrb[25].mxu0 }
0x1269   :  { %v2989_v19 = vadd.f32 %v3120_v15, %v2988_v18 }
0x126a   :  { %v2998_v20 = vadd.f32 %v2994_v17, %v4196_v52 }
0x126b   :  { %v2997_v54 = vadd.f32 %v2989_v19, %v4199_v53 }
0x126c   :  { %3000 = vst.msk [vmem:[#allocation2 + $0x8] sm:$0xff] %vm52_vm0, %v2998_v20 }
0x126d   :  { %2999 = vst.msk [vmem:[#allocation2] sm:$0xff] %vm52_vm0, %v2997_v54 }
0x126e   :  { %3741 = shalt.err (!%p3738_p4)
}
0x126f   :  { %s3742_s4 = scalar_lea.hbm %s4317_s14, 256 }
0x1270   :  { %p3743_p5 = scmp.ne.s32.totalorder %s4317_s14, %s3742_s4  ;;  %p3746_p6 = scmp.lt.u32.totalorder %s3742_s4, %s4317_s14 }
0x1272   :  { %p3748_p7 = pnand %p3746_p6, %p3743_p5 }
0x1274   :  { %3751 = shalt.err (!%p3748_p7)
}
0x1275   :  { %s3757_s7 = smov 128   ;;  %s3758_s28 = smov 8  }
0x1276   :  { %3012 = dma.vmem_to_hbm [thread:$0]  %s3007_s9, 256, %s4317_s14, [#allocation3], %s3757_s7, %s3757_s7, %s3758_s28  }
0x1277   :  { %3752 = dma.done.wait [#allocation3], 256  }
0x1278   :  { %3753 = vsyncadd [#allocation3], 4294967040 }
0x1279   :  { %3016 = vsyncpa [#allocation3], 1 }

</bundles_post_ra>
